<compile_context>
chip_gen: v5e
topology: v5e:2x2
jax: 0.10.0
libtpu: 0.0.40
codegen_flags: <defaults>
</compile_context>

<pallas_src>
import functools

import jax
import jax.numpy as jnp
from jax.experimental import pallas as pl
from jax.experimental.pallas import tpu as pltpu

LANE = 128


def _round_up(x, m):
    return (x + m - 1) // m * m


# ---------------------------------------------------------------------------
# Fused forward kernel (one grid step == one batch sample)
# ---------------------------------------------------------------------------
def _fused_forward_kernel(cols_ref, w1_ref, b1_ref, w2_ref, b2_ref,
                          fc1w_ref, fc1b_ref, fc2w_ref, fc2b_ref,
                          out_ref, p1_s, c2_s,
                          *, KH, KW, PW1, PH2, PW2, P1, span_pad):
    f32 = jnp.float32
    bf16 = jnp.bfloat16

    # -------- conv1 (im2col matmul) with fused 2x2 max-pool -----------------
    # cols_ref[j] holds the im2col patches of pooling partner j; the max over
    # the four partner conv outputs is exactly the 2x2 max-pool.
    m = jnp.dot(cols_ref[0], w1_ref[...], preferred_element_type=f32)
    for j in range(1, cols_ref.shape[0]):
        m = jnp.maximum(
            m, jnp.dot(cols_ref[j], w1_ref[...], preferred_element_type=f32))
    p1 = jnp.maximum(m + b1_ref[...], 0.0)                 # (P1, 128) f32
    p1_s[0:P1, :] = p1
    p1_s[P1:, :] = jnp.zeros((p1_s.shape[0] - P1, LANE), f32)

    # -------- conv2 as implicit GEMM over the 25 taps ------------------------
    # p1_s rows are the pooled conv1 activations flattened as ph*PW1 + pw.  For
    # tap (kh, kw) every conv2 output pixel's lhs row lives in one contiguous
    # span starting at kh*PW1 + kw (extra rows are over-computed and ignored).
    acc = jnp.zeros((span_pad, LANE), f32)
    for kh in range(KH):
        for kw in range(KW):
            base = kh * PW1 + kw
            lhs = p1_s[base:base + span_pad, :].astype(bf16)
            acc = acc + jnp.dot(lhs, w2_ref[kh * KW + kw],
                                preferred_element_type=f32)
    c2_s[...] = acc                                         # conv2 pre-activation

    # -------- fused pool2 + bias + ReLU + fc1 (flatten folded) + fc2 ---------
    b2 = b2_ref[...]
    facc = fc1b_ref[...]                                    # (1, 256) f32
    for ph2 in range(PH2):
        for pw2 in range(PW2):
            r = ph2 * PW2 + pw2
            rows = [(2 * ph2 + dh) * PW1 + (2 * pw2 + dw)
                    for dh in (0, 1) for dw in (0, 1)]
            v = c2_s[rows[0]:rows[0] + 1, :]
            for q in rows[1:]:
                v = jnp.maximum(v, c2_s[q:q + 1, :])
            pooled = jnp.maximum(v + b2, 0.0).astype(bf16)  # (1, 128)
            # NCHW-flatten permutation + channel padding folded into fc1w[r].
            facc = facc + jnp.dot(pooled, fc1w_ref[r],
                                  preferred_element_type=f32)
    h = jnp.maximum(facc, 0.0).astype(bf16)                 # (1, 256)
    logits = (jnp.dot(h, fc2w_ref[...], preferred_element_type=f32)
              + fc2b_ref[...])                              # (1, 128)
    out_ref[...] = jnp.broadcast_to(logits, out_ref.shape).astype(out_ref.dtype)


# ---------------------------------------------------------------------------
# Parameters (PyTorch layouts) and one-time packing into kernel layouts
# ---------------------------------------------------------------------------
def init_conv_agent_params(key, image_size, time_size, output_size):
    """Parameters in the PyTorch layouts (Conv2d OIHW, Linear (out, in))."""
    channels, height, width = image_size
    in_ch = channels + time_size     # mirrors the torch ctor (forward adds 1 ch)
    convw = ((width - 4) // 2 - 4) // 2
    convh = ((height - 4) // 2 - 4) // 2
    linear_input_size = 32 * convw * convh
    ks = jax.random.split(key, 8)
    s = 0.05
    return {
        "conv1_w": s * jax.random.normal(ks[0], (16, in_ch, 5, 5), jnp.float32),
        "conv1_b": s * jax.random.normal(ks[1], (16,), jnp.float32),
        "conv2_w": s * jax.random.normal(ks[2], (32, 16, 5, 5), jnp.float32),
        "conv2_b": s * jax.random.normal(ks[3], (32,), jnp.float32),
        "fc1_w": s * jax.random.normal(ks[4], (256, linear_input_size), jnp.float32),
        "fc1_b": s * jax.random.normal(ks[5], (256,), jnp.float32),
        "fc2_w": s * jax.random.normal(ks[6], (output_size, 256), jnp.float32),
        "fc2_b": s * jax.random.normal(ks[7], (output_size,), jnp.float32),
    }


def pack_params(params):
    """Pad / permute the PyTorch-layout parameters into the kernel layouts (once)."""
    OC1, IC1, KH, KW = params["conv1_w"].shape
    OC2 = params["conv2_w"].shape[0]
    K1 = KH * KW * IC1
    K1P = _round_up(K1, LANE)

    # conv1: OIHW -> (K1P, 128), rows ordered (kh, kw, c), cols = padded OC.
    w1 = jnp.transpose(params["conv1_w"], (2, 3, 1, 0)).reshape(K1, OC1)
    w1p = jnp.zeros((K1P, LANE), jnp.float32).at[:K1, :OC1].set(w1)
    b1p = jnp.zeros((1, LANE), jnp.float32).at[0, :OC1].set(params["conv1_b"])

    # conv2: OIHW -> (taps, 128, 128), IC and OC zero-padded to 128.
    w2 = jnp.transpose(params["conv2_w"], (2, 3, 1, 0)).reshape(KH * KW, OC1, OC2)
    w2p = jnp.zeros((KH * KW, LANE, LANE), jnp.float32).at[:, :OC1, :OC2].set(w2)
    b2p = jnp.zeros((1, LANE), jnp.float32).at[0, :OC2].set(params["conv2_b"])

    # fc1: fold the NCHW flatten (f = c*R + r) into per-position (128, 256) blocks.
    N1, lin_in = params["fc1_w"].shape
    R = lin_in // OC2
    fc1_t = params["fc1_w"].T.reshape(OC2, R, N1)   # [c, r, n]
    fc1_t = jnp.transpose(fc1_t, (1, 0, 2))         # [r, c, n]
    fc1p = jnp.zeros((R, LANE, N1), jnp.float32).at[:, :OC2, :].set(fc1_t)
    fc1b = params["fc1_b"].reshape(1, N1)

    # fc2: (out, 256) -> (256, 128) lane-padded.
    out_dim = params["fc2_w"].shape[0]
    assert out_dim <= LANE
    fc2p = jnp.zeros((N1, LANE), jnp.float32).at[:, :out_dim].set(params["fc2_w"].T)
    fc2b = jnp.zeros((1, LANE), jnp.float32).at[0, :out_dim].set(params["fc2_b"])

    return {
        "w1": w1p.astype(jnp.bfloat16), "b1": b1p,
        "w2": w2p.astype(jnp.bfloat16), "b2": b2p,
        "fc1w": fc1p.astype(jnp.bfloat16), "fc1b": fc1b,
        "fc2w": fc2p.astype(jnp.bfloat16), "fc2b": fc2b,
    }


# ---------------------------------------------------------------------------
# Forward pass
# ---------------------------------------------------------------------------
@functools.partial(jax.jit, static_argnames=("output_size",))
def conv_agent_forward(packed, x_img, x_time, *, output_size):
    if x_img.ndim == 3:
        x_img = x_img[None]
    B, C, H, W = x_img.shape

    # x_time.view(-1,1,1,1).repeat(1,1,H,W); cat on channel dim (NCHW), as torch.
    t = jnp.broadcast_to(
        x_time.reshape(-1, 1, 1, 1).astype(x_img.dtype), (B, 1, H, W))
    x = jnp.concatenate([x_img, t], axis=1)            # (B, C+1, H, W)
    x = jnp.transpose(x, (0, 2, 3, 1))                 # NHWC (channels -> lanes)
    Cin = C + 1                                        # (module requires time_size==1)

    KH = KW = 5
    OH1, OW1 = H - KH + 1, W - KW + 1
    PH1, PW1 = OH1 // 2, OW1 // 2
    P1 = PH1 * PW1
    OH2, OW2 = PH1 - KH + 1, PW1 - KW + 1
    PH2, PW2 = OH2 // 2, OW2 // 2
    R = PH2 * PW2
    span = (OH2 - 1) * PW1 + OW2
    span_pad = _round_up(span, 8)
    K1 = KH * KW * Cin
    K1P = packed["w1"].shape[0]
    N1 = packed["fc1w"].shape[2]
    assert _round_up(K1, LANE) == K1P and R == packed["fc1w"].shape[0]

    # im2col for conv1 with the four 2x2-pool partners stacked on a leading axis
    # (only host-side glue; ~100 KB bf16, read exactly once by the fused kernel).
    pat = jnp.stack(
        [x[:, kh:kh + OH1, kw:kw + OW1, :] for kh in range(KH) for kw in range(KW)],
        axis=3).reshape(B, OH1, OW1, K1)
    pat = jnp.pad(pat, ((0, 0), (0, 0), (0, 0), (0, K1P - K1)))
    pat = pat[:, :2 * PH1, :2 * PW1, :]
    cols = jnp.stack(
        [pat[:, dh::2, dw::2, :] for dh in (0, 1) for dw in (0, 1)], axis=1)
    cols = cols.reshape(B, 4, P1, K1P).astype(jnp.bfloat16)

    kernel = functools.partial(
        _fused_forward_kernel, KH=KH, KW=KW, PW1=PW1, PH2=PH2, PW2=PW2,
        P1=P1, span_pad=span_pad)

    out = pl.pallas_call(
        kernel,
        grid=(B,),
        in_specs=[
            pl.BlockSpec((None, 4, P1, K1P), lambda b: (b, 0, 0, 0)),   # cols
            pl.BlockSpec((K1P, LANE), lambda b: (0, 0)),                # w1
            pl.BlockSpec((1, LANE), lambda b: (0, 0)),                  # b1
            pl.BlockSpec((KH * KW, LANE, LANE), lambda b: (0, 0, 0)),   # w2
            pl.BlockSpec((1, LANE), lambda b: (0, 0)),                  # b2
            pl.BlockSpec((R, LANE, N1), lambda b: (0, 0, 0)),           # fc1w
            pl.BlockSpec((1, N1), lambda b: (0, 0)),                    # fc1b
            pl.BlockSpec((N1, LANE), lambda b: (0, 0)),                 # fc2w
            pl.BlockSpec((1, LANE), lambda b: (0, 0)),                  # fc2b
        ],
        out_specs=pl.BlockSpec((None, 8, LANE), lambda b: (b, 0, 0)),
        out_shape=jax.ShapeDtypeStruct((B, 8, LANE), jnp.float32),
        scratch_shapes=[
            pltpu.VMEM((P1 + 8, LANE), jnp.float32),    # pooled conv1 activations
            pltpu.VMEM((span_pad, LANE), jnp.float32),  # conv2 pre-activations
        ],
        compiler_params=pltpu.CompilerParams(dimension_semantics=("parallel",)),
    )(cols, packed["w1"], packed["b1"], packed["w2"], packed["b2"],
      packed["fc1w"], packed["fc1b"], packed["fc2w"], packed["fc2b"])

    return out[:, 0, :output_size]


# ---------------------------------------------------------------------------
# Pure-JAX (XLA) reference for validation
# ---------------------------------------------------------------------------
def reference_forward(params, x_img, x_time):
    if x_img.ndim == 3:
        x_img = x_img[None]
    B, _, H, W = x_img.shape
    t = jnp.broadcast_to(
        x_time.reshape(-1, 1, 1, 1).astype(x_img.dtype), (B, 1, H, W))
    x = jnp.concatenate([x_img, t], axis=1)

    def conv(v, w, b):
        y = jax.lax.conv_general_dilated(
            v, w, (1, 1), "VALID", dimension_numbers=("NCHW", "OIHW", "NCHW"))
        return jax.nn.relu(y + b.reshape(1, -1, 1, 1))

    def pool(v):
        b, c, h, w = v.shape
        v = v[:, :, : h // 2 * 2, : w // 2 * 2]
        return jnp.max(v.reshape(b, c, h // 2, 2, w // 2, 2), axis=(3, 5))

    x = pool(conv(x, params["conv1_w"], params["conv1_b"]))
    x = pool(conv(x, params["conv2_w"], params["conv2_b"]))
    x = x.reshape(B, -1)
    x = jax.nn.relu(x @ params["fc1_w"].T + params["fc1_b"])
    return x @ params["fc2_w"].T + params["fc2_b"]


if __name__ == "__main__":
    # 3-channel 20x20 image, time_size=1, 4 actions, batch 2
    # (conv trunk output: 32 x 2 x 2 = 128 features).
    image_size = (3, 20, 20)
    time_size = 1
    output_size = 4
    B = 2

    key = jax.random.PRNGKey(0)
    k_img, k_time, k_par = jax.random.split(key, 3)
    x_img = jax.random.normal(k_img, (B, *image_size), jnp.float32)
    x_time = jax.random.normal(k_time, (B,), jnp.float32)

    params = init_conv_agent_params(k_par, image_size, time_size, output_size)
    packed = pack_params(params)                  # one-time weight packing

    out = conv_agent_forward(packed, x_img, x_time, output_size=output_size)
    out = jax.block_until_ready(out)
    assert out.shape == (B, output_size), out.shape

    ref = reference_forward(params, x_img, x_time)
    err = float(jnp.max(jnp.abs(out - ref)))
    assert err < 2e-2, f"max abs error {err} vs f32 reference"

    print("KERNEL_OK")
</pallas_src>

<mosaic_0001>
module attributes {stable_mosaic.version = 11 : i64} {
  func.func @_fused_forward_kernel(%arg0: i32, %arg1: memref<1x4x64x128xbf16, #tpu.memory_space<vmem>>, %arg2: memref<128x128xbf16, #tpu.memory_space<vmem>>, %arg3: memref<1x128xf32, #tpu.memory_space<vmem>>, %arg4: memref<25x128x128xbf16, #tpu.memory_space<vmem>>, %arg5: memref<1x128xf32, #tpu.memory_space<vmem>>, %arg6: memref<4x128x256xbf16, #tpu.memory_space<vmem>>, %arg7: memref<1x256xf32, #tpu.memory_space<vmem>>, %arg8: memref<256x128xbf16, #tpu.memory_space<vmem>>, %arg9: memref<1x128xf32, #tpu.memory_space<vmem>>, %arg10: memref<1x8x128xf32, #tpu.memory_space<vmem>>, %arg11: memref<72x128xf32, #tpu.memory_space<vmem>>, %arg12: memref<32x128xf32, #tpu.memory_space<vmem>>) attributes {dimension_semantics = [#tpu.dimension_semantics<parallel>], iteration_bounds = array<i64: 2>, scalar_prefetch = 0 : i64, scratch_operands = 2 : i64, tpu.core_type = #tpu.core_type<tc>, window_params = [{transform_indices = @transform_0, window_bounds = array<i64: 1, 4, 64, 128>}, {pipeline_mode = #tpu.pipeline_mode<synchronous>, transform_indices = @transform_1, window_bounds = array<i64: 128, 128>}, {pipeline_mode = #tpu.pipeline_mode<synchronous>, transform_indices = @transform_2, window_bounds = array<i64: 1, 128>}, {pipeline_mode = #tpu.pipeline_mode<synchronous>, transform_indices = @transform_3, window_bounds = array<i64: 25, 128, 128>}, {pipeline_mode = #tpu.pipeline_mode<synchronous>, transform_indices = @transform_4, window_bounds = array<i64: 1, 128>}, {pipeline_mode = #tpu.pipeline_mode<synchronous>, transform_indices = @transform_5, window_bounds = array<i64: 4, 128, 256>}, {pipeline_mode = #tpu.pipeline_mode<synchronous>, transform_indices = @transform_6, window_bounds = array<i64: 1, 256>}, {pipeline_mode = #tpu.pipeline_mode<synchronous>, transform_indices = @transform_7, window_bounds = array<i64: 256, 128>}, {pipeline_mode = #tpu.pipeline_mode<synchronous>, transform_indices = @transform_8, window_bounds = array<i64: 1, 128>}, {transform_indices = @transform_9, window_bounds = array<i64: 1, 8, 128>}]} {
    %c0 = arith.constant 0 : index
    %c0_0 = arith.constant 0 : index
    %c0_1 = arith.constant 0 : index
    %c0_2 = arith.constant 0 : index
    %0 = vector.load %arg1[%c0, %c0_0, %c0_1, %c0_2] : memref<1x4x64x128xbf16, #tpu.memory_space<vmem>>, vector<1x1x64x128xbf16>
    %1 = vector.shape_cast %0 : vector<1x1x64x128xbf16> to vector<64x128xbf16>
    %c0_3 = arith.constant 0 : index
    %c0_4 = arith.constant 0 : index
    %2 = vector.load %arg2[%c0_3, %c0_4] : memref<128x128xbf16, #tpu.memory_space<vmem>>, vector<128x128xbf16>
    %cst = arith.constant dense<0.000000e+00> : vector<64x128xf32>
    %3 = tpu.matmul %1, %2, %cst {dimension_numbers = #tpu.dot_dimension_numbers<[1], [0], [0], [1], [0, 0, 1, 1], [], []>} : vector<64x128xbf16>, vector<128x128xbf16>, vector<64x128xf32> -> vector<64x128xf32>
    %c0_5 = arith.constant 0 : index
    %c1 = arith.constant 1 : index
    %c0_6 = arith.constant 0 : index
    %c0_7 = arith.constant 0 : index
    %4 = vector.load %arg1[%c0_5, %c1, %c0_6, %c0_7] : memref<1x4x64x128xbf16, #tpu.memory_space<vmem>>, vector<1x1x64x128xbf16>
    %5 = vector.shape_cast %4 : vector<1x1x64x128xbf16> to vector<64x128xbf16>
    %c0_8 = arith.constant 0 : index
    %c0_9 = arith.constant 0 : index
    %6 = vector.load %arg2[%c0_8, %c0_9] : memref<128x128xbf16, #tpu.memory_space<vmem>>, vector<128x128xbf16>
    %cst_10 = arith.constant dense<0.000000e+00> : vector<64x128xf32>
    %7 = tpu.matmul %5, %6, %cst_10 {dimension_numbers = #tpu.dot_dimension_numbers<[1], [0], [0], [1], [0, 0, 1, 1], [], []>} : vector<64x128xbf16>, vector<128x128xbf16>, vector<64x128xf32> -> vector<64x128xf32>
    %8 = arith.maximumf %3, %7 : vector<64x128xf32>
    %c0_11 = arith.constant 0 : index
    %c2 = arith.constant 2 : index
    %c0_12 = arith.constant 0 : index
    %c0_13 = arith.constant 0 : index
    %9 = vector.load %arg1[%c0_11, %c2, %c0_12, %c0_13] : memref<1x4x64x128xbf16, #tpu.memory_space<vmem>>, vector<1x1x64x128xbf16>
    %10 = vector.shape_cast %9 : vector<1x1x64x128xbf16> to vector<64x128xbf16>
    %c0_14 = arith.constant 0 : index
    %c0_15 = arith.constant 0 : index
    %11 = vector.load %arg2[%c0_14, %c0_15] : memref<128x128xbf16, #tpu.memory_space<vmem>>, vector<128x128xbf16>
    %cst_16 = arith.constant dense<0.000000e+00> : vector<64x128xf32>
    %12 = tpu.matmul %10, %11, %cst_16 {dimension_numbers = #tpu.dot_dimension_numbers<[1], [0], [0], [1], [0, 0, 1, 1], [], []>} : vector<64x128xbf16>, vector<128x128xbf16>, vector<64x128xf32> -> vector<64x128xf32>
    %13 = arith.maximumf %8, %12 : vector<64x128xf32>
    %c0_17 = arith.constant 0 : index
    %c3 = arith.constant 3 : index
    %c0_18 = arith.constant 0 : index
    %c0_19 = arith.constant 0 : index
    %14 = vector.load %arg1[%c0_17, %c3, %c0_18, %c0_19] : memref<1x4x64x128xbf16, #tpu.memory_space<vmem>>, vector<1x1x64x128xbf16>
    %15 = vector.shape_cast %14 : vector<1x1x64x128xbf16> to vector<64x128xbf16>
    %c0_20 = arith.constant 0 : index
    %c0_21 = arith.constant 0 : index
    %16 = vector.load %arg2[%c0_20, %c0_21] : memref<128x128xbf16, #tpu.memory_space<vmem>>, vector<128x128xbf16>
    %cst_22 = arith.constant dense<0.000000e+00> : vector<64x128xf32>
    %17 = tpu.matmul %15, %16, %cst_22 {dimension_numbers = #tpu.dot_dimension_numbers<[1], [0], [0], [1], [0, 0, 1, 1], [], []>} : vector<64x128xbf16>, vector<128x128xbf16>, vector<64x128xf32> -> vector<64x128xf32>
    %18 = arith.maximumf %13, %17 : vector<64x128xf32>
    %c0_23 = arith.constant 0 : index
    %c0_24 = arith.constant 0 : index
    %19 = vector.load %arg3[%c0_23, %c0_24] : memref<1x128xf32, #tpu.memory_space<vmem>>, vector<1x128xf32>
    %20 = vector.broadcast %19 : vector<1x128xf32> to vector<64x128xf32>
    %21 = arith.addf %18, %20 : vector<64x128xf32>
    %cst_25 = arith.constant 0.000000e+00 : f32
    %22 = vector.broadcast %cst_25 : f32 to vector<64x128xf32>
    %23 = arith.maximumf %21, %22 : vector<64x128xf32>
    %c0_26 = arith.constant 0 : index
    %c0_27 = arith.constant 0 : index
    %24 = vector.load %arg11[%c0_26, %c0_27] : memref<72x128xf32, #tpu.memory_space<vmem>>, vector<64x128xf32>
    tpu.vector_store %arg11[%c0_26, %c0_27], %23 {strides = array<i32>} : memref<72x128xf32, #tpu.memory_space<vmem>>, vector<64x128xf32>,
    %cst_28 = arith.constant 0.000000e+00 : f32
    %25 = vector.broadcast %cst_28 : f32 to vector<8x128xf32>
    %c64 = arith.constant 64 : index
    %c0_29 = arith.constant 0 : index
    %26 = vector.load %arg11[%c64, %c0_29] : memref<72x128xf32, #tpu.memory_space<vmem>>, vector<8x128xf32>
    tpu.vector_store %arg11[%c64, %c0_29], %25 {strides = array<i32>} : memref<72x128xf32, #tpu.memory_space<vmem>>, vector<8x128xf32>,
    %cst_30 = arith.constant 0.000000e+00 : f32
    %27 = vector.broadcast %cst_30 : f32 to vector<32x128xf32>
    %c0_31 = arith.constant 0 : index
    %c0_32 = arith.constant 0 : index
    %28 = vector.load %arg11[%c0_31, %c0_32] : memref<72x128xf32, #tpu.memory_space<vmem>>, vector<32x128xf32>
    %29 = arith.truncf %28 : vector<32x128xf32> to vector<32x128xbf16>
    %c0_33 = arith.constant 0 : index
    %c0_34 = arith.constant 0 : index
    %c0_35 = arith.constant 0 : index
    %30 = vector.load %arg4[%c0_33, %c0_34, %c0_35] : memref<25x128x128xbf16, #tpu.memory_space<vmem>>, vector<1x128x128xbf16>
    %31 = vector.shape_cast %30 : vector<1x128x128xbf16> to vector<128x128xbf16>
    %cst_36 = arith.constant dense<0.000000e+00> : vector<32x128xf32>
    %32 = tpu.matmul %29, %31, %cst_36 {dimension_numbers = #tpu.dot_dimension_numbers<[1], [0], [0], [1], [0, 0, 1, 1], [], []>} : vector<32x128xbf16>, vector<128x128xbf16>, vector<32x128xf32> -> vector<32x128xf32>
    %33 = arith.addf %27, %32 : vector<32x128xf32>
    %c1_37 = arith.constant 1 : index
    %c0_38 = arith.constant 0 : index
    %34 = vector.load %arg11[%c1_37, %c0_38] : memref<72x128xf32, #tpu.memory_space<vmem>>, vector<32x128xf32>
    %35 = arith.truncf %34 : vector<32x128xf32> to vector<32x128xbf16>
    %c1_39 = arith.constant 1 : index
    %c0_40 = arith.constant 0 : index
    %c0_41 = arith.constant 0 : index
    %36 = vector.load %arg4[%c1_39, %c0_40, %c0_41] : memref<25x128x128xbf16, #tpu.memory_space<vmem>>, vector<1x128x128xbf16>
    %37 = vector.shape_cast %36 : vector<1x128x128xbf16> to vector<128x128xbf16>
    %cst_42 = arith.constant dense<0.000000e+00> : vector<32x128xf32>
    %38 = tpu.matmul %35, %37, %cst_42 {dimension_numbers = #tpu.dot_dimension_numbers<[1], [0], [0], [1], [0, 0, 1, 1], [], []>} : vector<32x128xbf16>, vector<128x128xbf16>, vector<32x128xf32> -> vector<32x128xf32>
    %39 = arith.addf %33, %38 : vector<32x128xf32>
    %c2_43 = arith.constant 2 : index
    %c0_44 = arith.constant 0 : index
    %40 = vector.load %arg11[%c2_43, %c0_44] : memref<72x128xf32, #tpu.memory_space<vmem>>, vector<32x128xf32>
    %41 = arith.truncf %40 : vector<32x128xf32> to vector<32x128xbf16>
    %c2_45 = arith.constant 2 : index
    %c0_46 = arith.constant 0 : index
    %c0_47 = arith.constant 0 : index
    %42 = vector.load %arg4[%c2_45, %c0_46, %c0_47] : memref<25x128x128xbf16, #tpu.memory_space<vmem>>, vector<1x128x128xbf16>
    %43 = vector.shape_cast %42 : vector<1x128x128xbf16> to vector<128x128xbf16>
    %cst_48 = arith.constant dense<0.000000e+00> : vector<32x128xf32>
    %44 = tpu.matmul %41, %43, %cst_48 {dimension_numbers = #tpu.dot_dimension_numbers<[1], [0], [0], [1], [0, 0, 1, 1], [], []>} : vector<32x128xbf16>, vector<128x128xbf16>, vector<32x128xf32> -> vector<32x128xf32>
    %45 = arith.addf %39, %44 : vector<32x128xf32>
    %c3_49 = arith.constant 3 : index
    %c0_50 = arith.constant 0 : index
    %46 = vector.load %arg11[%c3_49, %c0_50] : memref<72x128xf32, #tpu.memory_space<vmem>>, vector<32x128xf32>
    %47 = arith.truncf %46 : vector<32x128xf32> to vector<32x128xbf16>
    %c3_51 = arith.constant 3 : index
    %c0_52 = arith.constant 0 : index
    %c0_53 = arith.constant 0 : index
    %48 = vector.load %arg4[%c3_51, %c0_52, %c0_53] : memref<25x128x128xbf16, #tpu.memory_space<vmem>>, vector<1x128x128xbf16>
    %49 = vector.shape_cast %48 : vector<1x128x128xbf16> to vector<128x128xbf16>
    %cst_54 = arith.constant dense<0.000000e+00> : vector<32x128xf32>
    %50 = tpu.matmul %47, %49, %cst_54 {dimension_numbers = #tpu.dot_dimension_numbers<[1], [0], [0], [1], [0, 0, 1, 1], [], []>} : vector<32x128xbf16>, vector<128x128xbf16>, vector<32x128xf32> -> vector<32x128xf32>
    %51 = arith.addf %45, %50 : vector<32x128xf32>
    %c4 = arith.constant 4 : index
    %c0_55 = arith.constant 0 : index
    %52 = vector.load %arg11[%c4, %c0_55] : memref<72x128xf32, #tpu.memory_space<vmem>>, vector<32x128xf32>
    %53 = arith.truncf %52 : vector<32x128xf32> to vector<32x128xbf16>
    %c4_56 = arith.constant 4 : index
    %c0_57 = arith.constant 0 : index
    %c0_58 = arith.constant 0 : index
    %54 = vector.load %arg4[%c4_56, %c0_57, %c0_58] : memref<25x128x128xbf16, #tpu.memory_space<vmem>>, vector<1x128x128xbf16>
    %55 = vector.shape_cast %54 : vector<1x128x128xbf16> to vector<128x128xbf16>
    %cst_59 = arith.constant dense<0.000000e+00> : vector<32x128xf32>
    %56 = tpu.matmul %53, %55, %cst_59 {dimension_numbers = #tpu.dot_dimension_numbers<[1], [0], [0], [1], [0, 0, 1, 1], [], []>} : vector<32x128xbf16>, vector<128x128xbf16>, vector<32x128xf32> -> vector<32x128xf32>
    %57 = arith.addf %51, %56 : vector<32x128xf32>
    %c8 = arith.constant 8 : index
    %c0_60 = arith.constant 0 : index
    %58 = vector.load %arg11[%c8, %c0_60] : memref<72x128xf32, #tpu.memory_space<vmem>>, vector<32x128xf32>
    %59 = arith.truncf %58 : vector<32x128xf32> to vector<32x128xbf16>
    %c5 = arith.constant 5 : index
    %c0_61 = arith.constant 0 : index
    %c0_62 = arith.constant 0 : index
    %60 = vector.load %arg4[%c5, %c0_61, %c0_62] : memref<25x128x128xbf16, #tpu.memory_space<vmem>>, vector<1x128x128xbf16>
    %61 = vector.shape_cast %60 : vector<1x128x128xbf16> to vector<128x128xbf16>
    %cst_63 = arith.constant dense<0.000000e+00> : vector<32x128xf32>
    %62 = tpu.matmul %59, %61, %cst_63 {dimension_numbers = #tpu.dot_dimension_numbers<[1], [0], [0], [1], [0, 0, 1, 1], [], []>} : vector<32x128xbf16>, vector<128x128xbf16>, vector<32x128xf32> -> vector<32x128xf32>
    %63 = arith.addf %57, %62 : vector<32x128xf32>
    %c9 = arith.constant 9 : index
    %c0_64 = arith.constant 0 : index
    %64 = vector.load %arg11[%c9, %c0_64] : memref<72x128xf32, #tpu.memory_space<vmem>>, vector<32x128xf32>
    %65 = arith.truncf %64 : vector<32x128xf32> to vector<32x128xbf16>
    %c6 = arith.constant 6 : index
    %c0_65 = arith.constant 0 : index
    %c0_66 = arith.constant 0 : index
    %66 = vector.load %arg4[%c6, %c0_65, %c0_66] : memref<25x128x128xbf16, #tpu.memory_space<vmem>>, vector<1x128x128xbf16>
    %67 = vector.shape_cast %66 : vector<1x128x128xbf16> to vector<128x128xbf16>
    %cst_67 = arith.constant dense<0.000000e+00> : vector<32x128xf32>
    %68 = tpu.matmul %65, %67, %cst_67 {dimension_numbers = #tpu.dot_dimension_numbers<[1], [0], [0], [1], [0, 0, 1, 1], [], []>} : vector<32x128xbf16>, vector<128x128xbf16>, vector<32x128xf32> -> vector<32x128xf32>
    %69 = arith.addf %63, %68 : vector<32x128xf32>
    %c10 = arith.constant 10 : index
    %c0_68 = arith.constant 0 : index
    %70 = vector.load %arg11[%c10, %c0_68] : memref<72x128xf32, #tpu.memory_space<vmem>>, vector<32x128xf32>
    %71 = arith.truncf %70 : vector<32x128xf32> to vector<32x128xbf16>
    %c7 = arith.constant 7 : index
    %c0_69 = arith.constant 0 : index
    %c0_70 = arith.constant 0 : index
    %72 = vector.load %arg4[%c7, %c0_69, %c0_70] : memref<25x128x128xbf16, #tpu.memory_space<vmem>>, vector<1x128x128xbf16>
    %73 = vector.shape_cast %72 : vector<1x128x128xbf16> to vector<128x128xbf16>
    %cst_71 = arith.constant dense<0.000000e+00> : vector<32x128xf32>
    %74 = tpu.matmul %71, %73, %cst_71 {dimension_numbers = #tpu.dot_dimension_numbers<[1], [0], [0], [1], [0, 0, 1, 1], [], []>} : vector<32x128xbf16>, vector<128x128xbf16>, vector<32x128xf32> -> vector<32x128xf32>
    %75 = arith.addf %69, %74 : vector<32x128xf32>
    %c11 = arith.constant 11 : index
    %c0_72 = arith.constant 0 : index
    %76 = vector.load %arg11[%c11, %c0_72] : memref<72x128xf32, #tpu.memory_space<vmem>>, vector<32x128xf32>
    %77 = arith.truncf %76 : vector<32x128xf32> to vector<32x128xbf16>
    %c8_73 = arith.constant 8 : index
    %c0_74 = arith.constant 0 : index
    %c0_75 = arith.constant 0 : index
    %78 = vector.load %arg4[%c8_73, %c0_74, %c0_75] : memref<25x128x128xbf16, #tpu.memory_space<vmem>>, vector<1x128x128xbf16>
    %79 = vector.shape_cast %78 : vector<1x128x128xbf16> to vector<128x128xbf16>
    %cst_76 = arith.constant dense<0.000000e+00> : vector<32x128xf32>
    %80 = tpu.matmul %77, %79, %cst_76 {dimension_numbers = #tpu.dot_dimension_numbers<[1], [0], [0], [1], [0, 0, 1, 1], [], []>} : vector<32x128xbf16>, vector<128x128xbf16>, vector<32x128xf32> -> vector<32x128xf32>
    %81 = arith.addf %75, %80 : vector<32x128xf32>
    %c12 = arith.constant 12 : index
    %c0_77 = arith.constant 0 : index
    %82 = vector.load %arg11[%c12, %c0_77] : memref<72x128xf32, #tpu.memory_space<vmem>>, vector<32x128xf32>
    %83 = arith.truncf %82 : vector<32x128xf32> to vector<32x128xbf16>
    %c9_78 = arith.constant 9 : index
    %c0_79 = arith.constant 0 : index
    %c0_80 = arith.constant 0 : index
    %84 = vector.load %arg4[%c9_78, %c0_79, %c0_80] : memref<25x128x128xbf16, #tpu.memory_space<vmem>>, vector<1x128x128xbf16>
    %85 = vector.shape_cast %84 : vector<1x128x128xbf16> to vector<128x128xbf16>
    %cst_81 = arith.constant dense<0.000000e+00> : vector<32x128xf32>
    %86 = tpu.matmul %83, %85, %cst_81 {dimension_numbers = #tpu.dot_dimension_numbers<[1], [0], [0], [1], [0, 0, 1, 1], [], []>} : vector<32x128xbf16>, vector<128x128xbf16>, vector<32x128xf32> -> vector<32x128xf32>
    %87 = arith.addf %81, %86 : vector<32x128xf32>
    %c16 = arith.constant 16 : index
    %c0_82 = arith.constant 0 : index
    %88 = vector.load %arg11[%c16, %c0_82] : memref<72x128xf32, #tpu.memory_space<vmem>>, vector<32x128xf32>
    %89 = arith.truncf %88 : vector<32x128xf32> to vector<32x128xbf16>
    %c10_83 = arith.constant 10 : index
    %c0_84 = arith.constant 0 : index
    %c0_85 = arith.constant 0 : index
    %90 = vector.load %arg4[%c10_83, %c0_84, %c0_85] : memref<25x128x128xbf16, #tpu.memory_space<vmem>>, vector<1x128x128xbf16>
    %91 = vector.shape_cast %90 : vector<1x128x128xbf16> to vector<128x128xbf16>
    %cst_86 = arith.constant dense<0.000000e+00> : vector<32x128xf32>
    %92 = tpu.matmul %89, %91, %cst_86 {dimension_numbers = #tpu.dot_dimension_numbers<[1], [0], [0], [1], [0, 0, 1, 1], [], []>} : vector<32x128xbf16>, vector<128x128xbf16>, vector<32x128xf32> -> vector<32x128xf32>
    %93 = arith.addf %87, %92 : vector<32x128xf32>
    %c17 = arith.constant 17 : index
    %c0_87 = arith.constant 0 : index
    %94 = vector.load %arg11[%c17, %c0_87] : memref<72x128xf32, #tpu.memory_space<vmem>>, vector<32x128xf32>
    %95 = arith.truncf %94 : vector<32x128xf32> to vector<32x128xbf16>
    %c11_88 = arith.constant 11 : index
    %c0_89 = arith.constant 0 : index
    %c0_90 = arith.constant 0 : index
    %96 = vector.load %arg4[%c11_88, %c0_89, %c0_90] : memref<25x128x128xbf16, #tpu.memory_space<vmem>>, vector<1x128x128xbf16>
    %97 = vector.shape_cast %96 : vector<1x128x128xbf16> to vector<128x128xbf16>
    %cst_91 = arith.constant dense<0.000000e+00> : vector<32x128xf32>
    %98 = tpu.matmul %95, %97, %cst_91 {dimension_numbers = #tpu.dot_dimension_numbers<[1], [0], [0], [1], [0, 0, 1, 1], [], []>} : vector<32x128xbf16>, vector<128x128xbf16>, vector<32x128xf32> -> vector<32x128xf32>
    %99 = arith.addf %93, %98 : vector<32x128xf32>
    %c18 = arith.constant 18 : index
    %c0_92 = arith.constant 0 : index
    %100 = vector.load %arg11[%c18, %c0_92] : memref<72x128xf32, #tpu.memory_space<vmem>>, vector<32x128xf32>
    %101 = arith.truncf %100 : vector<32x128xf32> to vector<32x128xbf16>
    %c12_93 = arith.constant 12 : index
    %c0_94 = arith.constant 0 : index
    %c0_95 = arith.constant 0 : index
    %102 = vector.load %arg4[%c12_93, %c0_94, %c0_95] : memref<25x128x128xbf16, #tpu.memory_space<vmem>>, vector<1x128x128xbf16>
    %103 = vector.shape_cast %102 : vector<1x128x128xbf16> to vector<128x128xbf16>
    %cst_96 = arith.constant dense<0.000000e+00> : vector<32x128xf32>
    %104 = tpu.matmul %101, %103, %cst_96 {dimension_numbers = #tpu.dot_dimension_numbers<[1], [0], [0], [1], [0, 0, 1, 1], [], []>} : vector<32x128xbf16>, vector<128x128xbf16>, vector<32x128xf32> -> vector<32x128xf32>
    %105 = arith.addf %99, %104 : vector<32x128xf32>
    %c19 = arith.constant 19 : index
    %c0_97 = arith.constant 0 : index
    %106 = vector.load %arg11[%c19, %c0_97] : memref<72x128xf32, #tpu.memory_space<vmem>>, vector<32x128xf32>
    %107 = arith.truncf %106 : vector<32x128xf32> to vector<32x128xbf16>
    %c13 = arith.constant 13 : index
    %c0_98 = arith.constant 0 : index
    %c0_99 = arith.constant 0 : index
    %108 = vector.load %arg4[%c13, %c0_98, %c0_99] : memref<25x128x128xbf16, #tpu.memory_space<vmem>>, vector<1x128x128xbf16>
    %109 = vector.shape_cast %108 : vector<1x128x128xbf16> to vector<128x128xbf16>
    %cst_100 = arith.constant dense<0.000000e+00> : vector<32x128xf32>
    %110 = tpu.matmul %107, %109, %cst_100 {dimension_numbers = #tpu.dot_dimension_numbers<[1], [0], [0], [1], [0, 0, 1, 1], [], []>} : vector<32x128xbf16>, vector<128x128xbf16>, vector<32x128xf32> -> vector<32x128xf32>
    %111 = arith.addf %105, %110 : vector<32x128xf32>
    %c20 = arith.constant 20 : index
    %c0_101 = arith.constant 0 : index
    %112 = vector.load %arg11[%c20, %c0_101] : memref<72x128xf32, #tpu.memory_space<vmem>>, vector<32x128xf32>
    %113 = arith.truncf %112 : vector<32x128xf32> to vector<32x128xbf16>
    %c14 = arith.constant 14 : index
    %c0_102 = arith.constant 0 : index
    %c0_103 = arith.constant 0 : index
    %114 = vector.load %arg4[%c14, %c0_102, %c0_103] : memref<25x128x128xbf16, #tpu.memory_space<vmem>>, vector<1x128x128xbf16>
    %115 = vector.shape_cast %114 : vector<1x128x128xbf16> to vector<128x128xbf16>
    %cst_104 = arith.constant dense<0.000000e+00> : vector<32x128xf32>
    %116 = tpu.matmul %113, %115, %cst_104 {dimension_numbers = #tpu.dot_dimension_numbers<[1], [0], [0], [1], [0, 0, 1, 1], [], []>} : vector<32x128xbf16>, vector<128x128xbf16>, vector<32x128xf32> -> vector<32x128xf32>
    %117 = arith.addf %111, %116 : vector<32x128xf32>
    %c24 = arith.constant 24 : index
    %c0_105 = arith.constant 0 : index
    %118 = vector.load %arg11[%c24, %c0_105] : memref<72x128xf32, #tpu.memory_space<vmem>>, vector<32x128xf32>
    %119 = arith.truncf %118 : vector<32x128xf32> to vector<32x128xbf16>
    %c15 = arith.constant 15 : index
    %c0_106 = arith.constant 0 : index
    %c0_107 = arith.constant 0 : index
    %120 = vector.load %arg4[%c15, %c0_106, %c0_107] : memref<25x128x128xbf16, #tpu.memory_space<vmem>>, vector<1x128x128xbf16>
    %121 = vector.shape_cast %120 : vector<1x128x128xbf16> to vector<128x128xbf16>
    %cst_108 = arith.constant dense<0.000000e+00> : vector<32x128xf32>
    %122 = tpu.matmul %119, %121, %cst_108 {dimension_numbers = #tpu.dot_dimension_numbers<[1], [0], [0], [1], [0, 0, 1, 1], [], []>} : vector<32x128xbf16>, vector<128x128xbf16>, vector<32x128xf32> -> vector<32x128xf32>
    %123 = arith.addf %117, %122 : vector<32x128xf32>
    %c25 = arith.constant 25 : index
    %c0_109 = arith.constant 0 : index
    %124 = vector.load %arg11[%c25, %c0_109] : memref<72x128xf32, #tpu.memory_space<vmem>>, vector<32x128xf32>
    %125 = arith.truncf %124 : vector<32x128xf32> to vector<32x128xbf16>
    %c16_110 = arith.constant 16 : index
    %c0_111 = arith.constant 0 : index
    %c0_112 = arith.constant 0 : index
    %126 = vector.load %arg4[%c16_110, %c0_111, %c0_112] : memref<25x128x128xbf16, #tpu.memory_space<vmem>>, vector<1x128x128xbf16>
    %127 = vector.shape_cast %126 : vector<1x128x128xbf16> to vector<128x128xbf16>
    %cst_113 = arith.constant dense<0.000000e+00> : vector<32x128xf32>
    %128 = tpu.matmul %125, %127, %cst_113 {dimension_numbers = #tpu.dot_dimension_numbers<[1], [0], [0], [1], [0, 0, 1, 1], [], []>} : vector<32x128xbf16>, vector<128x128xbf16>, vector<32x128xf32> -> vector<32x128xf32>
    %129 = arith.addf %123, %128 : vector<32x128xf32>
    %c26 = arith.constant 26 : index
    %c0_114 = arith.constant 0 : index
    %130 = vector.load %arg11[%c26, %c0_114] : memref<72x128xf32, #tpu.memory_space<vmem>>, vector<32x128xf32>
    %131 = arith.truncf %130 : vector<32x128xf32> to vector<32x128xbf16>
    %c17_115 = arith.constant 17 : index
    %c0_116 = arith.constant 0 : index
    %c0_117 = arith.constant 0 : index
    %132 = vector.load %arg4[%c17_115, %c0_116, %c0_117] : memref<25x128x128xbf16, #tpu.memory_space<vmem>>, vector<1x128x128xbf16>
    %133 = vector.shape_cast %132 : vector<1x128x128xbf16> to vector<128x128xbf16>
    %cst_118 = arith.constant dense<0.000000e+00> : vector<32x128xf32>
    %134 = tpu.matmul %131, %133, %cst_118 {dimension_numbers = #tpu.dot_dimension_numbers<[1], [0], [0], [1], [0, 0, 1, 1], [], []>} : vector<32x128xbf16>, vector<128x128xbf16>, vector<32x128xf32> -> vector<32x128xf32>
    %135 = arith.addf %129, %134 : vector<32x128xf32>
    %c27 = arith.constant 27 : index
    %c0_119 = arith.constant 0 : index
    %136 = vector.load %arg11[%c27, %c0_119] : memref<72x128xf32, #tpu.memory_space<vmem>>, vector<32x128xf32>
    %137 = arith.truncf %136 : vector<32x128xf32> to vector<32x128xbf16>
    %c18_120 = arith.constant 18 : index
    %c0_121 = arith.constant 0 : index
    %c0_122 = arith.constant 0 : index
    %138 = vector.load %arg4[%c18_120, %c0_121, %c0_122] : memref<25x128x128xbf16, #tpu.memory_space<vmem>>, vector<1x128x128xbf16>
    %139 = vector.shape_cast %138 : vector<1x128x128xbf16> to vector<128x128xbf16>
    %cst_123 = arith.constant dense<0.000000e+00> : vector<32x128xf32>
    %140 = tpu.matmul %137, %139, %cst_123 {dimension_numbers = #tpu.dot_dimension_numbers<[1], [0], [0], [1], [0, 0, 1, 1], [], []>} : vector<32x128xbf16>, vector<128x128xbf16>, vector<32x128xf32> -> vector<32x128xf32>
    %141 = arith.addf %135, %140 : vector<32x128xf32>
    %c28 = arith.constant 28 : index
    %c0_124 = arith.constant 0 : index
    %142 = vector.load %arg11[%c28, %c0_124] : memref<72x128xf32, #tpu.memory_space<vmem>>, vector<32x128xf32>
    %143 = arith.truncf %142 : vector<32x128xf32> to vector<32x128xbf16>
    %c19_125 = arith.constant 19 : index
    %c0_126 = arith.constant 0 : index
    %c0_127 = arith.constant 0 : index
    %144 = vector.load %arg4[%c19_125, %c0_126, %c0_127] : memref<25x128x128xbf16, #tpu.memory_space<vmem>>, vector<1x128x128xbf16>
    %145 = vector.shape_cast %144 : vector<1x128x128xbf16> to vector<128x128xbf16>
    %cst_128 = arith.constant dense<0.000000e+00> : vector<32x128xf32>
    %146 = tpu.matmul %143, %145, %cst_128 {dimension_numbers = #tpu.dot_dimension_numbers<[1], [0], [0], [1], [0, 0, 1, 1], [], []>} : vector<32x128xbf16>, vector<128x128xbf16>, vector<32x128xf32> -> vector<32x128xf32>
    %147 = arith.addf %141, %146 : vector<32x128xf32>
    %c32 = arith.constant 32 : index
    %c0_129 = arith.constant 0 : index
    %148 = vector.load %arg11[%c32, %c0_129] : memref<72x128xf32, #tpu.memory_space<vmem>>, vector<32x128xf32>
    %149 = arith.truncf %148 : vector<32x128xf32> to vector<32x128xbf16>
    %c20_130 = arith.constant 20 : index
    %c0_131 = arith.constant 0 : index
    %c0_132 = arith.constant 0 : index
    %150 = vector.load %arg4[%c20_130, %c0_131, %c0_132] : memref<25x128x128xbf16, #tpu.memory_space<vmem>>, vector<1x128x128xbf16>
    %151 = vector.shape_cast %150 : vector<1x128x128xbf16> to vector<128x128xbf16>
    %cst_133 = arith.constant dense<0.000000e+00> : vector<32x128xf32>
    %152 = tpu.matmul %149, %151, %cst_133 {dimension_numbers = #tpu.dot_dimension_numbers<[1], [0], [0], [1], [0, 0, 1, 1], [], []>} : vector<32x128xbf16>, vector<128x128xbf16>, vector<32x128xf32> -> vector<32x128xf32>
    %153 = arith.addf %147, %152 : vector<32x128xf32>
    %c33 = arith.constant 33 : index
    %c0_134 = arith.constant 0 : index
    %154 = vector.load %arg11[%c33, %c0_134] : memref<72x128xf32, #tpu.memory_space<vmem>>, vector<32x128xf32>
    %155 = arith.truncf %154 : vector<32x128xf32> to vector<32x128xbf16>
    %c21 = arith.constant 21 : index
    %c0_135 = arith.constant 0 : index
    %c0_136 = arith.constant 0 : index
    %156 = vector.load %arg4[%c21, %c0_135, %c0_136] : memref<25x128x128xbf16, #tpu.memory_space<vmem>>, vector<1x128x128xbf16>
    %157 = vector.shape_cast %156 : vector<1x128x128xbf16> to vector<128x128xbf16>
    %cst_137 = arith.constant dense<0.000000e+00> : vector<32x128xf32>
    %158 = tpu.matmul %155, %157, %cst_137 {dimension_numbers = #tpu.dot_dimension_numbers<[1], [0], [0], [1], [0, 0, 1, 1], [], []>} : vector<32x128xbf16>, vector<128x128xbf16>, vector<32x128xf32> -> vector<32x128xf32>
    %159 = arith.addf %153, %158 : vector<32x128xf32>
    %c34 = arith.constant 34 : index
    %c0_138 = arith.constant 0 : index
    %160 = vector.load %arg11[%c34, %c0_138] : memref<72x128xf32, #tpu.memory_space<vmem>>, vector<32x128xf32>
    %161 = arith.truncf %160 : vector<32x128xf32> to vector<32x128xbf16>
    %c22 = arith.constant 22 : index
    %c0_139 = arith.constant 0 : index
    %c0_140 = arith.constant 0 : index
    %162 = vector.load %arg4[%c22, %c0_139, %c0_140] : memref<25x128x128xbf16, #tpu.memory_space<vmem>>, vector<1x128x128xbf16>
    %163 = vector.shape_cast %162 : vector<1x128x128xbf16> to vector<128x128xbf16>
    %cst_141 = arith.constant dense<0.000000e+00> : vector<32x128xf32>
    %164 = tpu.matmul %161, %163, %cst_141 {dimension_numbers = #tpu.dot_dimension_numbers<[1], [0], [0], [1], [0, 0, 1, 1], [], []>} : vector<32x128xbf16>, vector<128x128xbf16>, vector<32x128xf32> -> vector<32x128xf32>
    %165 = arith.addf %159, %164 : vector<32x128xf32>
    %c35 = arith.constant 35 : index
    %c0_142 = arith.constant 0 : index
    %166 = vector.load %arg11[%c35, %c0_142] : memref<72x128xf32, #tpu.memory_space<vmem>>, vector<32x128xf32>
    %167 = arith.truncf %166 : vector<32x128xf32> to vector<32x128xbf16>
    %c23 = arith.constant 23 : index
    %c0_143 = arith.constant 0 : index
    %c0_144 = arith.constant 0 : index
    %168 = vector.load %arg4[%c23, %c0_143, %c0_144] : memref<25x128x128xbf16, #tpu.memory_space<vmem>>, vector<1x128x128xbf16>
    %169 = vector.shape_cast %168 : vector<1x128x128xbf16> to vector<128x128xbf16>
    %cst_145 = arith.constant dense<0.000000e+00> : vector<32x128xf32>
    %170 = tpu.matmul %167, %169, %cst_145 {dimension_numbers = #tpu.dot_dimension_numbers<[1], [0], [0], [1], [0, 0, 1, 1], [], []>} : vector<32x128xbf16>, vector<128x128xbf16>, vector<32x128xf32> -> vector<32x128xf32>
    %171 = arith.addf %165, %170 : vector<32x128xf32>
    %c36 = arith.constant 36 : index
    %c0_146 = arith.constant 0 : index
    %172 = vector.load %arg11[%c36, %c0_146] : memref<72x128xf32, #tpu.memory_space<vmem>>, vector<32x128xf32>
    %173 = arith.truncf %172 : vector<32x128xf32> to vector<32x128xbf16>
    %c24_147 = arith.constant 24 : index
    %c0_148 = arith.constant 0 : index
    %c0_149 = arith.constant 0 : index
    %174 = vector.load %arg4[%c24_147, %c0_148, %c0_149] : memref<25x128x128xbf16, #tpu.memory_space<vmem>>, vector<1x128x128xbf16>
    %175 = vector.shape_cast %174 : vector<1x128x128xbf16> to vector<128x128xbf16>
    %cst_150 = arith.constant dense<0.000000e+00> : vector<32x128xf32>
    %176 = tpu.matmul %173, %175, %cst_150 {dimension_numbers = #tpu.dot_dimension_numbers<[1], [0], [0], [1], [0, 0, 1, 1], [], []>} : vector<32x128xbf16>, vector<128x128xbf16>, vector<32x128xf32> -> vector<32x128xf32>
    %177 = arith.addf %171, %176 : vector<32x128xf32>
    %c0_151 = arith.constant 0 : index
    %c0_152 = arith.constant 0 : index
    %178 = vector.load %arg12[%c0_151, %c0_152] : memref<32x128xf32, #tpu.memory_space<vmem>>, vector<32x128xf32>
    tpu.vector_store %arg12[%c0_151, %c0_152], %177 {strides = array<i32>} : memref<32x128xf32, #tpu.memory_space<vmem>>, vector<32x128xf32>,
    %c0_153 = arith.constant 0 : index
    %c0_154 = arith.constant 0 : index
    %179 = vector.load %arg5[%c0_153, %c0_154] : memref<1x128xf32, #tpu.memory_space<vmem>>, vector<1x128xf32>
    %c0_155 = arith.constant 0 : index
    %c0_156 = arith.constant 0 : index
    %180 = vector.load %arg7[%c0_155, %c0_156] : memref<1x256xf32, #tpu.memory_space<vmem>>, vector<1x256xf32>
    %c0_157 = arith.constant 0 : index
    %c0_158 = arith.constant 0 : index
    %181 = vector.load %arg12[%c0_157, %c0_158] : memref<32x128xf32, #tpu.memory_space<vmem>>, vector<1x128xf32>
    %c1_159 = arith.constant 1 : index
    %c0_160 = arith.constant 0 : index
    %182 = vector.load %arg12[%c1_159, %c0_160] : memref<32x128xf32, #tpu.memory_space<vmem>>, vector<1x128xf32>
    %183 = arith.maximumf %181, %182 : vector<1x128xf32>
    %c8_161 = arith.constant 8 : index
    %c0_162 = arith.constant 0 : index
    %184 = vector.load %arg12[%c8_161, %c0_162] : memref<32x128xf32, #tpu.memory_space<vmem>>, vector<1x128xf32>
    %185 = arith.maximumf %183, %184 : vector<1x128xf32>
    %c9_163 = arith.constant 9 : index
    %c0_164 = arith.constant 0 : index
    %186 = vector.load %arg12[%c9_163, %c0_164] : memref<32x128xf32, #tpu.memory_space<vmem>>, vector<1x128xf32>
    %187 = arith.maximumf %185, %186 : vector<1x128xf32>
    %188 = arith.addf %187, %179 : vector<1x128xf32>
    %cst_165 = arith.constant 0.000000e+00 : f32
    %189 = vector.broadcast %cst_165 : f32 to vector<1x128xf32>
    %190 = arith.maximumf %188, %189 : vector<1x128xf32>
    %191 = arith.truncf %190 : vector<1x128xf32> to vector<1x128xbf16>
    %c0_166 = arith.constant 0 : index
    %c0_167 = arith.constant 0 : index
    %c0_168 = arith.constant 0 : index
    %192 = vector.load %arg6[%c0_166, %c0_167, %c0_168] : memref<4x128x256xbf16, #tpu.memory_space<vmem>>, vector<1x128x256xbf16>
    %193 = vector.shape_cast %192 : vector<1x128x256xbf16> to vector<128x256xbf16>
    %cst_169 = arith.constant dense<0.000000e+00> : vector<1x256xf32>
    %194 = tpu.matmul %191, %193, %cst_169 {dimension_numbers = #tpu.dot_dimension_numbers<[1], [0], [0], [1], [0, 0, 1, 1], [], []>} : vector<1x128xbf16>, vector<128x256xbf16>, vector<1x256xf32> -> vector<1x256xf32>
    %195 = arith.addf %180, %194 : vector<1x256xf32>
    %c2_170 = arith.constant 2 : index
    %c0_171 = arith.constant 0 : index
    %196 = vector.load %arg12[%c2_170, %c0_171] : memref<32x128xf32, #tpu.memory_space<vmem>>, vector<1x128xf32>
    %c3_172 = arith.constant 3 : index
    %c0_173 = arith.constant 0 : index
    %197 = vector.load %arg12[%c3_172, %c0_173] : memref<32x128xf32, #tpu.memory_space<vmem>>, vector<1x128xf32>
    %198 = arith.maximumf %196, %197 : vector<1x128xf32>
    %c10_174 = arith.constant 10 : index
    %c0_175 = arith.constant 0 : index
    %199 = vector.load %arg12[%c10_174, %c0_175] : memref<32x128xf32, #tpu.memory_space<vmem>>, vector<1x128xf32>
    %200 = arith.maximumf %198, %199 : vector<1x128xf32>
    %c11_176 = arith.constant 11 : index
    %c0_177 = arith.constant 0 : index
    %201 = vector.load %arg12[%c11_176, %c0_177] : memref<32x128xf32, #tpu.memory_space<vmem>>, vector<1x128xf32>
    %202 = arith.maximumf %200, %201 : vector<1x128xf32>
    %203 = arith.addf %202, %179 : vector<1x128xf32>
    %cst_178 = arith.constant 0.000000e+00 : f32
    %204 = vector.broadcast %cst_178 : f32 to vector<1x128xf32>
    %205 = arith.maximumf %203, %204 : vector<1x128xf32>
    %206 = arith.truncf %205 : vector<1x128xf32> to vector<1x128xbf16>
    %c1_179 = arith.constant 1 : index
    %c0_180 = arith.constant 0 : index
    %c0_181 = arith.constant 0 : index
    %207 = vector.load %arg6[%c1_179, %c0_180, %c0_181] : memref<4x128x256xbf16, #tpu.memory_space<vmem>>, vector<1x128x256xbf16>
    %208 = vector.shape_cast %207 : vector<1x128x256xbf16> to vector<128x256xbf16>
    %cst_182 = arith.constant dense<0.000000e+00> : vector<1x256xf32>
    %209 = tpu.matmul %206, %208, %cst_182 {dimension_numbers = #tpu.dot_dimension_numbers<[1], [0], [0], [1], [0, 0, 1, 1], [], []>} : vector<1x128xbf16>, vector<128x256xbf16>, vector<1x256xf32> -> vector<1x256xf32>
    %210 = arith.addf %195, %209 : vector<1x256xf32>
    %c16_183 = arith.constant 16 : index
    %c0_184 = arith.constant 0 : index
    %211 = vector.load %arg12[%c16_183, %c0_184] : memref<32x128xf32, #tpu.memory_space<vmem>>, vector<1x128xf32>
    %c17_185 = arith.constant 17 : index
    %c0_186 = arith.constant 0 : index
    %212 = vector.load %arg12[%c17_185, %c0_186] : memref<32x128xf32, #tpu.memory_space<vmem>>, vector<1x128xf32>
    %213 = arith.maximumf %211, %212 : vector<1x128xf32>
    %c24_187 = arith.constant 24 : index
    %c0_188 = arith.constant 0 : index
    %214 = vector.load %arg12[%c24_187, %c0_188] : memref<32x128xf32, #tpu.memory_space<vmem>>, vector<1x128xf32>
    %215 = arith.maximumf %213, %214 : vector<1x128xf32>
    %c25_189 = arith.constant 25 : index
    %c0_190 = arith.constant 0 : index
    %216 = vector.load %arg12[%c25_189, %c0_190] : memref<32x128xf32, #tpu.memory_space<vmem>>, vector<1x128xf32>
    %217 = arith.maximumf %215, %216 : vector<1x128xf32>
    %218 = arith.addf %217, %179 : vector<1x128xf32>
    %cst_191 = arith.constant 0.000000e+00 : f32
    %219 = vector.broadcast %cst_191 : f32 to vector<1x128xf32>
    %220 = arith.maximumf %218, %219 : vector<1x128xf32>
    %221 = arith.truncf %220 : vector<1x128xf32> to vector<1x128xbf16>
    %c2_192 = arith.constant 2 : index
    %c0_193 = arith.constant 0 : index
    %c0_194 = arith.constant 0 : index
    %222 = vector.load %arg6[%c2_192, %c0_193, %c0_194] : memref<4x128x256xbf16, #tpu.memory_space<vmem>>, vector<1x128x256xbf16>
    %223 = vector.shape_cast %222 : vector<1x128x256xbf16> to vector<128x256xbf16>
    %cst_195 = arith.constant dense<0.000000e+00> : vector<1x256xf32>
    %224 = tpu.matmul %221, %223, %cst_195 {dimension_numbers = #tpu.dot_dimension_numbers<[1], [0], [0], [1], [0, 0, 1, 1], [], []>} : vector<1x128xbf16>, vector<128x256xbf16>, vector<1x256xf32> -> vector<1x256xf32>
    %225 = arith.addf %210, %224 : vector<1x256xf32>
    %c18_196 = arith.constant 18 : index
    %c0_197 = arith.constant 0 : index
    %226 = vector.load %arg12[%c18_196, %c0_197] : memref<32x128xf32, #tpu.memory_space<vmem>>, vector<1x128xf32>
    %c19_198 = arith.constant 19 : index
    %c0_199 = arith.constant 0 : index
    %227 = vector.load %arg12[%c19_198, %c0_199] : memref<32x128xf32, #tpu.memory_space<vmem>>, vector<1x128xf32>
    %228 = arith.maximumf %226, %227 : vector<1x128xf32>
    %c26_200 = arith.constant 26 : index
    %c0_201 = arith.constant 0 : index
    %229 = vector.load %arg12[%c26_200, %c0_201] : memref<32x128xf32, #tpu.memory_space<vmem>>, vector<1x128xf32>
    %230 = arith.maximumf %228, %229 : vector<1x128xf32>
    %c27_202 = arith.constant 27 : index
    %c0_203 = arith.constant 0 : index
    %231 = vector.load %arg12[%c27_202, %c0_203] : memref<32x128xf32, #tpu.memory_space<vmem>>, vector<1x128xf32>
    %232 = arith.maximumf %230, %231 : vector<1x128xf32>
    %233 = arith.addf %232, %179 : vector<1x128xf32>
    %cst_204 = arith.constant 0.000000e+00 : f32
    %234 = vector.broadcast %cst_204 : f32 to vector<1x128xf32>
    %235 = arith.maximumf %233, %234 : vector<1x128xf32>
    %236 = arith.truncf %235 : vector<1x128xf32> to vector<1x128xbf16>
    %c3_205 = arith.constant 3 : index
    %c0_206 = arith.constant 0 : index
    %c0_207 = arith.constant 0 : index
    %237 = vector.load %arg6[%c3_205, %c0_206, %c0_207] : memref<4x128x256xbf16, #tpu.memory_space<vmem>>, vector<1x128x256xbf16>
    %238 = vector.shape_cast %237 : vector<1x128x256xbf16> to vector<128x256xbf16>
    %cst_208 = arith.constant dense<0.000000e+00> : vector<1x256xf32>
    %239 = tpu.matmul %236, %238, %cst_208 {dimension_numbers = #tpu.dot_dimension_numbers<[1], [0], [0], [1], [0, 0, 1, 1], [], []>} : vector<1x128xbf16>, vector<128x256xbf16>, vector<1x256xf32> -> vector<1x256xf32>
    %240 = arith.addf %225, %239 : vector<1x256xf32>
    %cst_209 = arith.constant 0.000000e+00 : f32
    %241 = vector.broadcast %cst_209 : f32 to vector<1x256xf32>
    %242 = arith.maximumf %240, %241 : vector<1x256xf32>
    %243 = arith.truncf %242 : vector<1x256xf32> to vector<1x256xbf16>
    %c0_210 = arith.constant 0 : index
    %c0_211 = arith.constant 0 : index
    %244 = vector.load %arg8[%c0_210, %c0_211] : memref<256x128xbf16, #tpu.memory_space<vmem>>, vector<256x128xbf16>
    %cst_212 = arith.constant dense<0.000000e+00> : vector<1x128xf32>
    %245 = tpu.matmul %243, %244, %cst_212 {dimension_numbers = #tpu.dot_dimension_numbers<[1], [0], [0], [1], [0, 0, 1, 1], [], []>} : vector<1x256xbf16>, vector<256x128xbf16>, vector<1x128xf32> -> vector<1x128xf32>
    %c0_213 = arith.constant 0 : index
    %c0_214 = arith.constant 0 : index
    %246 = vector.load %arg9[%c0_213, %c0_214] : memref<1x128xf32, #tpu.memory_space<vmem>>, vector<1x128xf32>
    %247 = arith.addf %245, %246 : vector<1x128xf32>
    %248 = vector.shape_cast %247 : vector<1x128xf32> to vector<1x128xf32>
    %249 = vector.broadcast %248 : vector<1x128xf32> to vector<8x128xf32>
    %c0_215 = arith.constant 0 : index
    %c0_216 = arith.constant 0 : index
    %c0_217 = arith.constant 0 : index
    %250 = vector.load %arg10[%c0_215, %c0_216, %c0_217] : memref<1x8x128xf32, #tpu.memory_space<vmem>>, vector<1x8x128xf32>
    %251 = vector.shape_cast %250 : vector<1x8x128xf32> to vector<8x128xf32>
    %252 = vector.shape_cast %249 : vector<8x128xf32> to vector<1x8x128xf32>
    tpu.vector_store %arg10[%c0_215, %c0_216, %c0_217], %252 {strides = array<i32>} : memref<1x8x128xf32, #tpu.memory_space<vmem>>, vector<1x8x128xf32>,
    return
  }
  func.func @transform_0(%arg0: i32) -> (i32, i32, i32, i32) {
    %c0_i32 = arith.constant 0 : i32
    %c0_i32_0 = arith.constant 0 : i32
    %c0_i32_1 = arith.constant 0 : i32
    %c0_i32_2 = arith.constant 0 : i32
    return %arg0, %c0_i32, %c0_i32_0, %c0_i32_1 : i32, i32, i32, i32
  }
  func.func @transform_1(%arg0: i32) -> (i32, i32) {
    %c0_i32 = arith.constant 0 : i32
    %c0_i32_0 = arith.constant 0 : i32
    %c0_i32_1 = arith.constant 0 : i32
    return %c0_i32, %c0_i32_0 : i32, i32
  }
  func.func @transform_2(%arg0: i32) -> (i32, i32) {
    %c0_i32 = arith.constant 0 : i32
    %c0_i32_0 = arith.constant 0 : i32
    %c0_i32_1 = arith.constant 0 : i32
    return %c0_i32, %c0_i32_0 : i32, i32
  }
  func.func @transform_3(%arg0: i32) -> (i32, i32, i32) {
    %c0_i32 = arith.constant 0 : i32
    %c0_i32_0 = arith.constant 0 : i32
    %c0_i32_1 = arith.constant 0 : i32
    %c0_i32_2 = arith.constant 0 : i32
    return %c0_i32, %c0_i32_0, %c0_i32_1 : i32, i32, i32
  }
  func.func @transform_4(%arg0: i32) -> (i32, i32) {
    %c0_i32 = arith.constant 0 : i32
    %c0_i32_0 = arith.constant 0 : i32
    %c0_i32_1 = arith.constant 0 : i32
    return %c0_i32, %c0_i32_0 : i32, i32
  }
  func.func @transform_5(%arg0: i32) -> (i32, i32, i32) {
    %c0_i32 = arith.constant 0 : i32
    %c0_i32_0 = arith.constant 0 : i32
    %c0_i32_1 = arith.constant 0 : i32
    %c0_i32_2 = arith.constant 0 : i32
    return %c0_i32, %c0_i32_0, %c0_i32_1 : i32, i32, i32
  }
  func.func @transform_6(%arg0: i32) -> (i32, i32) {
    %c0_i32 = arith.constant 0 : i32
    %c0_i32_0 = arith.constant 0 : i32
    %c0_i32_1 = arith.constant 0 : i32
    return %c0_i32, %c0_i32_0 : i32, i32
  }
  func.func @transform_7(%arg0: i32) -> (i32, i32) {
    %c0_i32 = arith.constant 0 : i32
    %c0_i32_0 = arith.constant 0 : i32
    %c0_i32_1 = arith.constant 0 : i32
    return %c0_i32, %c0_i32_0 : i32, i32
  }
  func.func @transform_8(%arg0: i32) -> (i32, i32) {
    %c0_i32 = arith.constant 0 : i32
    %c0_i32_0 = arith.constant 0 : i32
    %c0_i32_1 = arith.constant 0 : i32
    return %c0_i32, %c0_i32_0 : i32, i32
  }
  func.func @transform_9(%arg0: i32) -> (i32, i32, i32) {
    %c0_i32 = arith.constant 0 : i32
    %c0_i32_0 = arith.constant 0 : i32
    %c0_i32_1 = arith.constant 0 : i32
    return %arg0, %c0_i32, %c0_i32_0 : i32, i32, i32
  }
}

</mosaic_0001>

<bundles_post_ra>
// kernel: conv_agent_forward.1
= control target key start
LH: loop header
LB: loop body
LE: loop exit
PB: predicated region body
PF: predicated region fallthrough
CT: control target
= control target key end

     0   :  { %s5872_s30 = smov 0   ;;  %s7267_s0 = inlined_call_operand.vmem [shape: bf16[2,4,64,128], index: 0, kind: input, shape index: {}]   ;;  %s7268_s1 = inlined_call_operand.vmem [shape: bf16[128,128], index: 1, kind: input, shape index: {}]   ;;  %s7269_s2 = inlined_call_operand.vmem [shape: f32[1,128], index: 2, kind: input, shape index: {}]   ;;  %s7270_s3 = inlined_call_operand.vmem [shape: bf16[25,128,128], index: 3, kind: input, shape index: {}]   ;;  %s7271_s4 = inlined_call_operand.vmem [shape: f32[1,128], index: 4, kind: input, shape index: {}]   ;;  %s7272_s5 = inlined_call_operand.vmem [shape: bf16[4,128,256], index: 5, kind: input, shape index: {}]   ;;  %s7273_s6 = inlined_call_operand.vmem [shape: f32[1,256], index: 6, kind: input, shape index: {}]   ;;  %s7274_s7 = inlined_call_operand.vmem [shape: bf16[256,128], index: 7, kind: input, shape index: {}]   ;;  %s7275_s8 = inlined_call_operand.vmem [shape: f32[1,128], index: 8, kind: input, shape index: {}]   ;;  %s7276_s9 = inlined_call_operand.vmem [shape: f32[2,8,128], index: 9, kind: output, shape index: {}]  }
   0x1 LB: > { %s3816_s10 = sadd.s32 4294967295, %s5819_s30   ;;  %p3820_p0 = scmp.ge.s32.totalorder %s5819_s30, 1  ;;  %s5819_s30 = sphi %s5872_s30, %s19_s30  }
   0x2   : > { %p287_p1 = scmp.lt.s32.totalorder %s5819_s30, 3 }
   0x4   : > { %p288_p2 = pnand %p3820_p0, %p287_p1 }
   0x5   : > { %p322_p3 = scmp.lt.s32.totalorder (!%p288_p2), %s3816_s10, 1 }
   0x6   : > { %291 = sbr.rel (%p288_p2) target bundleno = 857 (0x359), region = 56 }
   0xb   : > { %v5510_v0 = vld [vmem:[%s7268_s1 + $0x38] sm:$0xff]  ;;  %v5509_v1 = vld [vmem:[%s7268_s1 + $0x30] sm:$0xff]  ;;  %v5508_v2 = vld [vmem:[%s7268_s1 + $0x28] sm:$0xff]  ;;  %s7278_s10 = smov (!%p322_p3, %s3816_s10), 1  ;;  %vm3177_vm0 = vcmask 1040384  }
   0xc   : > { %427 = vmatpush.bf16.msra.mxu0 %v5510_v0  ;;  %489 = vmatpush.bf16.msra.mxu1 %v5510_v0  ;;  %v5507_v3 = vld [vmem:[%s7268_s1 + $0x20] sm:$0xff]  ;;  %v5506_v4 = vld [vmem:[%s7268_s1 + $0x18] sm:$0xff]  ;;  %v5505_v5 = vld [vmem:[%s7268_s1 + $0x10] sm:$0xff]  ;;  %s5498_s25 = sshll.u32 %s7278_s10, 7  ;;  %s3823_s24 = sshll.u32 %s7278_s10, 3 }
   0xd   : > { %559 = vmatpush.bf16.msra.mxu2 %v5510_v0  ;;  %629 = vmatpush.bf16.msra.mxu3 %v5510_v0  ;;  %v5504_v6 = vld [vmem:[%s7268_s1 + $0x8] sm:$0xff]  ;;  %v5503_v7 = vld [vmem:[%s7268_s1] sm:$0xff]  ;;  %s5914_s11 = scalar_lea.vmem %s7267_s0, %s5498_s25  ;;  %v5538_v16 = vld [vmem:[%s7270_s3 + $0x78] sm:$0xff]  ;;  %s330_s27 = scalar_lea.vmem %s7276_s9, %s3823_s24 }
   0xe   : > { %v5499_v8 = vld [vmem:[%s5914_s11] sm:$0xff]  ;;  %v5500_v12 = vld [vmem:[%s5914_s11 + $0x8] sm:$0xff]  ;;  %v5546_v17 = vld [vmem:[%s7270_s3 + $0xb8] sm:$0xff] }
   0xf   : > { %v5511_v9 = vld [vmem:[%s5914_s11 + $0x20] sm:$0xff]  ;;  %v5512_v13 = vld [vmem:[%s5914_s11 + $0x28] sm:$0xff]  ;;  %v5537_v18 = vld [vmem:[%s7270_s3 + $0x70] sm:$0xff] }
  0x10   : > { %428 = vmatpush.bf16.msra.mxu0 %v5509_v1  ;;  %490 = vmatpush.bf16.msra.mxu1 %v5509_v1  ;;  %v5515_v10 = vld [vmem:[%s5914_s11 + $0x40] sm:$0xff]  ;;  %v5516_v14 = vld [vmem:[%s5914_s11 + $0x48] sm:$0xff]  ;;  %v5501_v20 = vld [vmem:[%s5914_s11 + $0x10] sm:$0xff] }
  0x11   : > { %560 = vmatpush.bf16.msra.mxu2 %v5509_v1  ;;  %630 = vmatpush.bf16.msra.mxu3 %v5509_v1  ;;  %v5519_v11 = vld [vmem:[%s5914_s11 + $0x60] sm:$0xff]  ;;  %v5520_v15 = vld [vmem:[%s5914_s11 + $0x68] sm:$0xff]  ;;  %v5513_v21 = vld [vmem:[%s5914_s11 + $0x30] sm:$0xff] }
  0x12   : > { %v5536_v19 = vld [vmem:[%s7270_s3 + $0x68] sm:$0xff]  ;;  %v5517_v22 = vld [vmem:[%s5914_s11 + $0x50] sm:$0xff]  ;;  %v5502_v24 = vld [vmem:[%s5914_s11 + $0x18] sm:$0xff] }
  0x13   : > { %v5521_v23 = vld [vmem:[%s5914_s11 + $0x70] sm:$0xff]  ;;  %v5514_v25 = vld [vmem:[%s5914_s11 + $0x38] sm:$0xff]  ;;  %v5535_v30 = vld [vmem:[%s7270_s3 + $0x60] sm:$0xff] }
  0x14   : > { %429 = vmatpush.bf16.msra.mxu0 %v5508_v2  ;;  %491 = vmatpush.bf16.msra.mxu1 %v5508_v2  ;;  %v5518_v26 = vld [vmem:[%s5914_s11 + $0x58] sm:$0xff]  ;;  %v5529_v29 = vld [vmem:[%s7270_s3 + $0x30] sm:$0xff]  ;;  %v5528_v32 = vld [vmem:[%s7270_s3 + $0x28] sm:$0xff] }
  0x15   : > { %561 = vmatpush.bf16.msra.mxu2 %v5508_v2  ;;  %631 = vmatpush.bf16.msra.mxu3 %v5508_v2  ;;  %v5522_v27 = vld [vmem:[%s5914_s11 + $0x78] sm:$0xff]  ;;  %v5527_v33 = vld [vmem:[%s7270_s3 + $0x20] sm:$0xff]  ;;  %v5545_v35 = vld [vmem:[%s7270_s3 + $0xb0] sm:$0xff] }
  0x16   : > { %v5530_v28 = vld [vmem:[%s7270_s3 + $0x38] sm:$0xff]  ;;  %v5553_v36 = vld [vmem:[%s7270_s3 + $0xf0] sm:$0xff]  ;;  %v5544_v39 = vld [vmem:[%s7270_s3 + $0xa8] sm:$0xff] }
  0x17   : > { %v5554_v31 = vld [vmem:[%s7270_s3 + $0xf8] sm:$0xff]  ;;  %v5525_v37 = vld [vmem:[%s7270_s3 + $0x10] sm:$0xff]  ;;  %v5552_v40 = vld [vmem:[%s7270_s3 + $0xe8] sm:$0xff] }
  0x18   : > { %430 = vmatpush.bf16.msra.mxu0 %v5507_v3  ;;  %492 = vmatpush.bf16.msra.mxu1 %v5507_v3  ;;  %v5526_v34 = vld [vmem:[%s7270_s3 + $0x18] sm:$0xff]  ;;  %v5524_v41 = vld [vmem:[%s7270_s3 + $0x8] sm:$0xff]  ;;  %v5543_v42 = vld [vmem:[%s7270_s3 + $0xa0] sm:$0xff] }
  0x19   : > { %562 = vmatpush.bf16.msra.mxu2 %v5507_v3  ;;  %632 = vmatpush.bf16.msra.mxu3 %v5507_v3  ;;  %v5534_v38 = vld [vmem:[%s7270_s3 + $0x58] sm:$0xff]  ;;  %v5551_v43 = vld [vmem:[%s7270_s3 + $0xe0] sm:$0xff]  ;;  %v5533_v45 = vld [vmem:[%s7270_s3 + $0x50] sm:$0xff] }
  0x1a   : > { %v5523_v44 = vld [vmem:[%s7270_s3] sm:$0xff]  ;;  %v5542_v46 = vld [vmem:[%s7270_s3 + $0x98] sm:$0xff]  ;;  %v5541_v49 = vld [vmem:[%s7270_s3 + $0x90] sm:$0xff] }
  0x1b   : > { %v5550_v47 = vld [vmem:[%s7270_s3 + $0xd8] sm:$0xff]  ;;  %v5549_v50 = vld [vmem:[%s7270_s3 + $0xd0] sm:$0xff]  ;;  %v5532_v54 = vld [vmem:[%s7270_s3 + $0x48] sm:$0xff] }
  0x1c   : > { %431 = vmatpush.bf16.msra.mxu0 %v5506_v4  ;;  %493 = vmatpush.bf16.msra.mxu1 %v5506_v4  ;;  %v5570_v48 = vld [vmem:[%s7270_s3 + $0x178] sm:$0xff]  ;;  %v5569_v51 = vld [vmem:[%s7270_s3 + $0x170] sm:$0xff]  ;;  %v5540_v55 = vld [vmem:[%s7270_s3 + $0x88] sm:$0xff] }
  0x1d   : > { %563 = vmatpush.bf16.msra.mxu2 %v5506_v4  ;;  %633 = vmatpush.bf16.msra.mxu3 %v5506_v4  ;;  %v5548_v56 = vld [vmem:[%s7270_s3 + $0xc8] sm:$0xff]  ;;  %v5531_v59 = vld [vmem:[%s7270_s3 + $0x40] sm:$0xff] }
  0x1e   : > { %v5568_v57 = vld [vmem:[%s7270_s3 + $0x168] sm:$0xff]  ;;  %v5539_v60 = vld [vmem:[%s7270_s3 + $0x80] sm:$0xff] }
  0x1f   : > { %v5547_v61 = vld [vmem:[%s7270_s3 + $0xc0] sm:$0xff] }
  0x20   : > { %432 = vmatpush.bf16.msra.mxu0 %v5505_v5  ;;  %494 = vmatpush.bf16.msra.mxu1 %v5505_v5  ;;  %v5567_v62 = vld [vmem:[%s7270_s3 + $0x160] sm:$0xff] }
  0x21   : > { %564 = vmatpush.bf16.msra.mxu2 %v5505_v5  ;;  %634 = vmatpush.bf16.msra.mxu3 %v5505_v5  ;;  %v6043_v2 = vld [vmem:[%s7269_s2] ss:$0 sm:$0xff] }
  0x24   : > { %433 = vmatpush.bf16.msra.mxu0 %v5504_v6  ;;  %495 = vmatpush.bf16.msra.mxu1 %v5504_v6 }
  0x25   : > { %565 = vmatpush.bf16.msra.mxu2 %v5504_v6  ;;  %635 = vmatpush.bf16.msra.mxu3 %v5504_v6  ;;  %v5562_v6 = vld [vmem:[%s7270_s3 + $0x138] sm:$0xff] }
  0x28   : > { %434 = vmatpush.bf16.msra.mxu0 %v5503_v7  ;;  %496 = vmatpush.bf16.msra.mxu1 %v5503_v7 }
  0x29   : > { %566 = vmatpush.bf16.msra.mxu2 %v5503_v7  ;;  %636 = vmatpush.bf16.msra.mxu3 %v5503_v7  ;;  %v5578_v7 = vld [vmem:[%s7270_s3 + $0x1b8] sm:$0xff] }
  0x2b   : > { %435 = vmatmul.bf16.vlgmr.msra.gmra.mxu0 %v5499_v8  ;;  %497 = vmatmul.bf16.vlgmr.msra.gmra.mxu1 %v5511_v9  ;;  %v5586_v8 = vld [vmem:[%s7270_s3 + $0x1f8] sm:$0xff] }
  0x2c   : > { %567 = vmatmul.bf16.vlgmr.msra.gmra.mxu2 %v5515_v10  ;;  %637 = vmatmul.bf16.vlgmr.msra.gmra.mxu3 %v5519_v11  ;;  %v5566_v9 = vld [vmem:[%s7270_s3 + $0x158] sm:$0xff] }
  0x2d   : > { %788 = vmatpush.bf16.msrb.mxu0 %v5538_v16  ;;  %945 = vmatpush.bf16.msrb.mxu2 %v5546_v17 }
  0x2e   : > { %855 = vmatpush.bf16.msrb.mxu1 %v5530_v28  ;;  %1039 = vmatpush.bf16.msrb.mxu3 %v5554_v31  ;;  %v5575_v31 = vld [vmem:[%s7270_s3 + $0x1a0] sm:$0xff] }
  0x31   : > { %789 = vmatpush.bf16.msrb.mxu0 %v5537_v18  ;;  %946 = vmatpush.bf16.msrb.mxu2 %v5545_v35  ;;  %v5565_v18 = vld [vmem:[%s7270_s3 + $0x150] sm:$0xff]  ;;  %v5563_v35 = vld [vmem:[%s7270_s3 + $0x140] sm:$0xff] }
  0x32   : > { %856 = vmatpush.bf16.msrb.mxu1 %v5529_v29  ;;  %1040 = vmatpush.bf16.msrb.mxu3 %v5553_v36 }
  0x35   : > { %790 = vmatpush.bf16.msrb.mxu0 %v5536_v19  ;;  %947 = vmatpush.bf16.msrb.mxu2 %v5544_v39 }
  0x36   : > { %857 = vmatpush.bf16.msrb.mxu1 %v5528_v32  ;;  %1041 = vmatpush.bf16.msrb.mxu3 %v5552_v40  ;;  %v5583_v32 = vld [vmem:[%s7270_s3 + $0x1e0] sm:$0xff] }
  0x39   : > { %791 = vmatpush.bf16.msrb.mxu0 %v5535_v30  ;;  %948 = vmatpush.bf16.msrb.mxu2 %v5543_v42  ;;  %v5559_v30 = vld [vmem:[%s7270_s3 + $0x120] sm:$0xff]  ;;  %v5574_v42 = vld [vmem:[%s7270_s3 + $0x198] sm:$0xff] }
  0x3a   : > { %858 = vmatpush.bf16.msrb.mxu1 %v5527_v33  ;;  %1042 = vmatpush.bf16.msrb.mxu3 %v5551_v43  ;;  %v5582_v43 = vld [vmem:[%s7270_s3 + $0x1d8] sm:$0xff] }
  0x3b   : > { %440 = vmatmul.bf16.gmra.mxu0 %v5500_v12  ;;  %502 = vmatmul.bf16.gmra.mxu1 %v5512_v13  ;;  %v5561_v13 = vld [vmem:[%s7270_s3 + $0x130] sm:$0xff] }
  0x3c   : > { %572 = vmatmul.bf16.gmra.mxu2 %v5516_v14  ;;  %642 = vmatmul.bf16.gmra.mxu3 %v5520_v15  ;;  %v5577_v14 = vld [vmem:[%s7270_s3 + $0x1b0] sm:$0xff] }
  0x3d   : > { %792 = vmatpush.bf16.msrb.mxu0 %v5534_v38  ;;  %949 = vmatpush.bf16.msrb.mxu2 %v5542_v46  ;;  %v5585_v15 = vld [vmem:[%s7270_s3 + $0x1f0] sm:$0xff] }
  0x3e   : > { %859 = vmatpush.bf16.msrb.mxu1 %v5526_v34  ;;  %1043 = vmatpush.bf16.msrb.mxu3 %v5550_v47 }
  0x41   : > { %793 = vmatpush.bf16.msrb.mxu0 %v5533_v45  ;;  %950 = vmatpush.bf16.msrb.mxu2 %v5541_v49  ;;  %v5573_v49 = vld [vmem:[%s7270_s3 + $0x190] sm:$0xff] }
  0x42   : > { %860 = vmatpush.bf16.msrb.mxu1 %v5525_v37  ;;  %1044 = vmatpush.bf16.msrb.mxu3 %v5549_v50  ;;  %v5581_v50 = vld [vmem:[%s7270_s3 + $0x1d0] sm:$0xff] }
  0x45   : > { %794 = vmatpush.bf16.msrb.mxu0 %v5532_v54  ;;  %951 = vmatpush.bf16.msrb.mxu2 %v5540_v55 }
  0x46   : > { %861 = vmatpush.bf16.msrb.mxu1 %v5524_v41  ;;  %1045 = vmatpush.bf16.msrb.mxu3 %v5548_v56  ;;  %v5558_v41 = vld [vmem:[%s7270_s3 + $0x118] sm:$0xff]  ;;  %v5601_v56 = vld [vmem:[%s7270_s3 + $0x270] sm:$0xff] }
  0x49   : > { %795 = vmatpush.bf16.msrb.mxu0 %v5531_v59  ;;  %952 = vmatpush.bf16.msrb.mxu2 %v5539_v60  ;;  %v5572_v59 = vld [vmem:[%s7270_s3 + $0x188] sm:$0xff] }
  0x4a   : > { %862 = vmatpush.bf16.msrb.mxu1 %v5523_v44  ;;  %1046 = vmatpush.bf16.msrb.mxu3 %v5547_v61  ;;  %v5602_v44 = vld [vmem:[%s7270_s3 + $0x278] sm:$0xff]  ;;  %v5580_v60 = vld [vmem:[%s7270_s3 + $0x1c8] sm:$0xff] }
  0x4b   : > { %445 = vmatmul.bf16.gmra.mxu0 %v5501_v20  ;;  %507 = vmatmul.bf16.gmra.mxu1 %v5513_v21  ;;  %v5600_v61 = vld [vmem:[%s7270_s3 + $0x268] sm:$0xff] }
  0x4c   : > { %577 = vmatmul.bf16.gmra.mxu2 %v5517_v22  ;;  %647 = vmatmul.bf16.gmra.mxu3 %v5521_v23  ;;  %v5560_v23 = vld [vmem:[%s7270_s3 + $0x128] sm:$0xff] }
  0x4d   : > { %1133 = vmatpush.bf16.msra.mxu0 %v5562_v6  ;;  %1321 = vmatpush.bf16.msra.mxu2 %v5578_v7  ;;  %v5571_v6 = vld [vmem:[%s7270_s3 + $0x180] sm:$0xff] }
  0x4e   : > { %1227 = vmatpush.bf16.msra.mxu1 %v5570_v48  ;;  %1415 = vmatpush.bf16.msra.mxu3 %v5586_v8  ;;  %v5557_v48 = vld [vmem:[%s7270_s3 + $0x110] sm:$0xff] }
  0x51   : > { %1134 = vmatpush.bf16.msra.mxu0 %v5561_v13  ;;  %1322 = vmatpush.bf16.msra.mxu2 %v5577_v14 }
  0x52   : > { %1228 = vmatpush.bf16.msra.mxu1 %v5569_v51  ;;  %1416 = vmatpush.bf16.msra.mxu3 %v5585_v15 }
  0x55   : > { %1135 = vmatpush.bf16.msra.mxu0 %v5560_v23  ;;  %v5610_v23 = vld [vmem:[%s7270_s3 + $0x2b8] sm:$0xff] }
  0x56   : > { %1229 = vmatpush.bf16.msra.mxu1 %v5568_v57 }
  0x59   : > { %1136 = vmatpush.bf16.msra.mxu0 %v5559_v30 }
  0x5a   : > { %1230 = vmatpush.bf16.msra.mxu1 %v5567_v62 }
  0x5b   : > { %450 = vmatmul.bf16.gmra.mxu0 %v5502_v24  ;;  %512 = vmatmul.bf16.gmra.mxu1 %v5514_v25  ;;  %v5576_v24 = vld [vmem:[%s7270_s3 + $0x1a8] sm:$0xff] }
  0x5c   : > { %582 = vmatmul.bf16.gmra.mxu2 %v5518_v26  ;;  %652 = vmatmul.bf16.gmra.mxu3 %v5522_v27  ;;  %v5584_v25 = vld [vmem:[%s7270_s3 + $0x1e8] sm:$0xff] }
  0x5d   : > { %v5564_v26 = vld [vmem:[%s7270_s3 + $0x148] sm:$0xff]  ;;  %1323 = vmatpush.bf16.msra.mxu2 %v5576_v24  ;;  %1417 = vmatpush.bf16.msra.mxu3 %v5584_v25  ;;  %v5618_v24 = vld [vmem:[%s7270_s3 + $0x2f8] sm:$0xff] }
  0x5e   : > { %1231 = vmatpush.bf16.msra.mxu1 %v5566_v9  ;;  %1137 = vmatpush.bf16.msra.mxu0 %v5558_v41 }
  0x61   : > { %1324 = vmatpush.bf16.msra.mxu2 %v5575_v31  ;;  %1418 = vmatpush.bf16.msra.mxu3 %v5583_v32  ;;  %v5598_v32 = vld [vmem:[%s7270_s3 + $0x258] sm:$0xff] }
  0x62   : > { %1232 = vmatpush.bf16.msra.mxu1 %v5565_v18  ;;  %1138 = vmatpush.bf16.msra.mxu0 %v5557_v48  ;;  %v5579_v18 = vld [vmem:[%s7270_s3 + $0x1c0] sm:$0xff] }
  0x65   : > { %1325 = vmatpush.bf16.msra.mxu2 %v5574_v42  ;;  %1419 = vmatpush.bf16.msra.mxu3 %v5582_v43  ;;  %v5597_v42 = vld [vmem:[%s7270_s3 + $0x250] sm:$0xff] }
  0x66   : > { %1233 = vmatpush.bf16.msra.mxu1 %v5564_v26  ;;  %v5593_v26 = vld [vmem:[%s7270_s3 + $0x230] sm:$0xff] }
  0x69   : > { %1326 = vmatpush.bf16.msra.mxu2 %v5573_v49  ;;  %1420 = vmatpush.bf16.msra.mxu3 %v5581_v50 }
  0x6a   : > { %1234 = vmatpush.bf16.msra.mxu1 %v5563_v35 }
  0x6d   : > { %1327 = vmatpush.bf16.msra.mxu2 %v5572_v59  ;;  %1421 = vmatpush.bf16.msra.mxu3 %v5580_v60 }
  0x71   : > { %1328 = vmatpush.bf16.msra.mxu2 %v5571_v6  ;;  %1422 = vmatpush.bf16.msra.mxu3 %v5579_v18  ;;  %v5590_v6 = vld [vmem:[%s7270_s3 + $0x218] sm:$0xff] }
  0xa8   : > { %v436_v52 = vpop.f32.mrf.mxu0  ;;  %v498_v53 = vpop.f32.mrf.mxu1 }
  0xa9   : > { %v518_v58 = vmax.f32 %v436_v52, %v498_v53 }
  0xaf   : > { %v568_v63 = vpop.f32.mrf.mxu2  ;;  %v638_v0 = vpop.f32.mrf.mxu3 }
  0xb0   : > { %v588_v1 = vmax.f32 %v518_v58, %v568_v63  ;;  %v438_v3 = vpop.f32.mrf.mxu0  ;;  %v500_v4 = vpop.f32.mrf.mxu1  ;;  %v5556_v58 = vld [vmem:[%s7270_s3 + $0x108] sm:$0xff] }
  0xb1   : > { %v519_v12 = vmax.f32 %v438_v3, %v500_v4  ;;  %1139 = vmatpush.bf16.msra.mxu0 %v5556_v58 }
  0xb2   : > { %v658_v5 = vmax.f32 %v588_v1, %v638_v0 }
  0xb4   : > { %v670_v10 = vadd.f32 %v6043_v2, %v658_v5  ;;  %v5555_v5 = vld [vmem:[%s7270_s3 + $0x100] sm:$0xff] }
  0xb5   : > { %1140 = vmatpush.bf16.msra.mxu0 %v5555_v5 }
  0xb6   : > { %v678_v11 = vmax.f32 %v670_v10, 0.0 }
  0xb7   : > { %v570_v16 = vpop.f32.mrf.mxu2  ;;  %v640_v17 = vpop.f32.mrf.mxu3 }
  0xb8   : > { %686 = vst [vmem:[#allocation2] sm:$0xff] %v678_v11  ;;  %v589_v19 = vmax.f32 %v519_v12, %v570_v16  ;;  %v441_v20 = vpop.f32.mrf.mxu0  ;;  %v503_v21 = vpop.f32.mrf.mxu1 }
  0xb9   : > { %v520_v28 = vmax.f32 %v441_v20, %v503_v21  ;;  %v5599_v20 = vld [vmem:[%s7270_s3 + $0x260] sm:$0xff] }
  0xba   : > { %v659_v22 = vmax.f32 %v589_v19, %v640_v17 }
  0xbc   : > { %v671_v27 = vadd.f32 %v6043_v2, %v659_v22  ;;  %v5594_v22 = vld [vmem:[%s7270_s3 + $0x238] sm:$0xff] }
  0xbe   : > { %v6083_v29 = vmax.f32 %v671_v27, 0.0  ;;  %v5609_v27 = vld [vmem:[%s7270_s3 + $0x2b0] sm:$0xff] }
  0xbf   : > { %v573_v33 = vpop.f32.mrf.mxu2  ;;  %v643_v34 = vpop.f32.mrf.mxu3 }
  0xc0   : > { %687 = vst [vmem:[#allocation2 + $0x8] sm:$0xff] %v6083_v29  ;;  %v590_v36 = vmax.f32 %v520_v28, %v573_v33  ;;  %v443_v37 = vpop.f32.mrf.mxu0  ;;  %v505_v38 = vpop.f32.mrf.mxu1  ;;  %v699_v39 = vpack.c.bf16 %v6083_v29, %v678_v11  ;;  %v5617_v28 = vld [vmem:[%s7270_s3 + $0x2f0] sm:$0xff] }
  0xc1   : > { %v521_v47 = vmax.f32 %v443_v37, %v505_v38  ;;  %v5592_v38 = vld [vmem:[%s7270_s3 + $0x228] sm:$0xff] }
  0xc2   : > { %v660_v40 = vmax.f32 %v590_v36, %v643_v34  ;;  %863 = vmatmul.bf16.vlgmr.msrb.gmra.mxu1 %v699_v39  ;;  %v5608_v39 = vld [vmem:[%s7270_s3 + $0x2a8] sm:$0xff] }
  0xc3   : > { %1603 = vmatpush.bf16.msrb.mxu1 %v5602_v44 }
  0xc4   : > { %v672_v45 = vadd.f32 %v6043_v2, %v660_v40  ;;  %v5616_v40 = vld [vmem:[%s7270_s3 + $0x2e8] sm:$0xff] }
  0xc6   : > { %v6112_v46 = vmax.f32 %v672_v45, 0.0  ;;  %v5591_v45 = vld [vmem:[%s7270_s3 + $0x220] sm:$0xff] }
  0xc7   : > { %v575_v51 = vpop.f32.mrf.mxu2  ;;  %v645_v52 = vpop.f32.mrf.mxu3  ;;  %1604 = vmatpush.bf16.msrb.mxu1 %v5601_v56  ;;  %v717_v0 = vld [vmem:[#allocation2 + $0x1] sm:$0xff] }
  0xc8   : > { %688 = vst [vmem:[#allocation2 + $0x10] sm:$0xff] %v6112_v46  ;;  %v591_v53 = vmax.f32 %v521_v47, %v575_v51  ;;  %v446_v54 = vpop.f32.mrf.mxu0  ;;  %v508_v55 = vpop.f32.mrf.mxu1  ;;  %v874_v1 = vld [vmem:[#allocation2 + $0x2] sm:$0xff] }
  0xc9   : > { %v522_v63 = vmax.f32 %v446_v54, %v508_v55  ;;  %v968_v4 = vld [vmem:[#allocation2 + $0x3] sm:$0xff] }
  0xca   : > { %v661_v57 = vmax.f32 %v591_v53, %v645_v52  ;;  %v5607_v47 = vld [vmem:[%s7270_s3 + $0x2a0] sm:$0xff] }
  0xcb   : > { %1605 = vmatpush.bf16.msrb.mxu1 %v5600_v61  ;;  %v5615_v61 = vld [vmem:[%s7270_s3 + $0x2e0] sm:$0xff] }
  0xcc   : > { %v673_v62 = vadd.f32 %v6043_v2, %v661_v57 }
  0xce   : > { %v6140_v3 = vmax.f32 %v673_v62, 0.0  ;;  %v5596_v62 = vld [vmem:[%s7270_s3 + $0x248] sm:$0xff] }
  0xcf   : > { %v578_v7 = vpop.f32.mrf.mxu2  ;;  %v648_v8 = vpop.f32.mrf.mxu3  ;;  %v6148_v9 = vld [vmem:[#allocation2 + $0x9] sm:$0xff]  ;;  %1606 = vmatpush.bf16.msrb.mxu1 %v5599_v20 }
  0xd0   : > { %v6150_v10 = vld [vmem:[#allocation2 + $0xa] sm:$0xff]  ;;  %689 = vst [vmem:[#allocation2 + $0x18] sm:$0xff] %v6140_v3  ;;  %v592_v12 = vmax.f32 %v522_v63, %v578_v7  ;;  %v448_v13 = vpop.f32.mrf.mxu0  ;;  %v510_v14 = vpop.f32.mrf.mxu1  ;;  %v721_v15 = vpack.c.bf16 %v6148_v9, %v717_v0  ;;  %v6163_v19 = vpack.c.bf16 %v6140_v3, %v6112_v46  ;;  %v5606_v7 = vld [vmem:[%s7270_s3 + $0x298] sm:$0xff] }
  0xd1   : > { %v6152_v11 = vld [vmem:[#allocation2 + $0xb] sm:$0xff]  ;;  %v878_v16 = vpack.c.bf16 %v6150_v10, %v874_v1  ;;  %v523_v31 = vmax.f32 %v448_v13, %v510_v14  ;;  %v1160_v1 = vpack.c.bf16 %v6112_v46, %v6083_v29 }
  0xd2   : > { %v972_v17 = vpack.c.bf16 %v6152_v11, %v968_v4  ;;  %v662_v21 = vmax.f32 %v592_v12, %v648_v8  ;;  %796 = vmatmul.bf16.vlgmr.msrb.gmra.mxu0 %v721_v15  ;;  %868 = vmatmul.bf16.gmra.mxu1 %v6163_v19  ;;  %v5614_v8 = vld [vmem:[%s7270_s3 + $0x2d8] sm:$0xff]  ;;  %v5595_v12 = vld [vmem:[%s7270_s3 + $0x240] sm:$0xff]  ;;  %v5589_v13 = vld [vmem:[%s7270_s3 + $0x210] sm:$0xff] }
  0xd3   : > { %953 = vmatmul.bf16.vlgmr.msrb.gmra.mxu2 %v878_v16  ;;  %1509 = vmatpush.bf16.msrb.mxu0 %v5594_v22  ;;  %v5605_v14 = vld [vmem:[%s7270_s3 + $0x290] sm:$0xff]  ;;  %v5634_v16 = vld [vmem:[%s7270_s3 + $0x378] sm:$0xff]  ;;  %v5588_v22 = vld [vmem:[%s7270_s3 + $0x208] sm:$0xff] }
  0xd4   : > { %1047 = vmatmul.bf16.vlgmr.msrb.gmra.mxu3 %v972_v17  ;;  %v674_v25 = vadd.f32 %v6043_v2, %v662_v21  ;;  %1697 = vmatpush.bf16.msrb.mxu2 %v5610_v23  ;;  %v5613_v21 = vld [vmem:[%s7270_s3 + $0x2d0] sm:$0xff]  ;;  %v5604_v23 = vld [vmem:[%s7270_s3 + $0x288] sm:$0xff] }
  0xd5   : > { %1791 = vmatpush.bf16.msrb.mxu3 %v5618_v24  ;;  %1607 = vmatpush.bf16.msrb.mxu1 %v5598_v32  ;;  %v5603_v32 = vld [vmem:[%s7270_s3 + $0x280] sm:$0xff] }
  0xd6   : > { %v6188_v30 = vmax.f32 %v674_v25, 0.0  ;;  %v5633_v25 = vld [vmem:[%s7270_s3 + $0x370] sm:$0xff] }
  0xd7   : > { %v580_v33 = vpop.f32.mrf.mxu2  ;;  %v650_v34 = vpop.f32.mrf.mxu3  ;;  %1510 = vmatpush.bf16.msrb.mxu0 %v5593_v26  ;;  %v6213_v49 = vld [vmem:[#allocation2 + $0x11] sm:$0xff] }
  0xd8   : > { %690 = vst [vmem:[#allocation2 + $0x20] sm:$0xff] %v6188_v30  ;;  %v593_v35 = vmax.f32 %v523_v31, %v580_v33  ;;  %v451_v36 = vpop.f32.mrf.mxu0  ;;  %v513_v37 = vpop.f32.mrf.mxu1  ;;  %1698 = vmatpush.bf16.msrb.mxu2 %v5609_v27  ;;  %v6215_v50 = vld [vmem:[#allocation2 + $0x12] sm:$0xff]  ;;  %v5612_v27 = vld [vmem:[%s7270_s3 + $0x2c8] sm:$0xff]  ;;  %v5587_v31 = vld [vmem:[%s7270_s3 + $0x200] sm:$0xff] }
  0xd9   : > { %1792 = vmatpush.bf16.msrb.mxu3 %v5617_v28  ;;  %v524_v44 = vmax.f32 %v451_v36, %v513_v37  ;;  %v6217_v51 = vld [vmem:[#allocation2 + $0x13] sm:$0xff]  ;;  %1608 = vmatpush.bf16.msrb.mxu1 %v5597_v42  ;;  %v5611_v36 = vld [vmem:[%s7270_s3 + $0x2c0] sm:$0xff]  ;;  %v5632_v37 = vld [vmem:[%s7270_s3 + $0x368] sm:$0xff] }
  0xda   : > { %v663_v41 = vmax.f32 %v593_v35, %v650_v34  ;;  %v6294_v28 = vld [vmem:[#allocation2 + $0xc] sm:$0xff]  ;;  %v1254_v35 = vpack.c.bf16 %v6213_v49, %v6148_v9  ;;  %v5626_v9 = vld [vmem:[%s7270_s3 + $0x338] sm:$0xff] }
  0xdb   : > { %1511 = vmatpush.bf16.msrb.mxu0 %v5592_v38  ;;  %v1348_v38 = vpack.c.bf16 %v6215_v50, %v6150_v10  ;;  %v5650_v10 = vld [vmem:[%s7270_s3 + $0x3f8] sm:$0xff]  ;;  %v5649_v42 = vld [vmem:[%s7270_s3 + $0x3f0] sm:$0xff] }
  0xdc   : > { %v675_v43 = vadd.f32 %v6043_v2, %v663_v41  ;;  %1699 = vmatpush.bf16.msrb.mxu2 %v5608_v39  ;;  %v1161_v39 = vpack.c.bf16 %v6188_v30, %v6140_v3  ;;  %v5631_v3 = vld [vmem:[%s7270_s3 + $0x360] sm:$0xff]  ;;  %v5641_v41 = vld [vmem:[%s7270_s3 + $0x3b0] sm:$0xff] }
  0xdd   : > { %1793 = vmatpush.bf16.msrb.mxu3 %v5616_v40  ;;  %1609 = vmatpush.bf16.msrb.mxu1 %v5596_v62  ;;  %v5642_v40 = vld [vmem:[%s7270_s3 + $0x3b8] sm:$0xff] }
  0xde   : > { %v683_v48 = vmax.f32 %v675_v43, 0.0  ;;  %v5630_v43 = vld [vmem:[%s7270_s3 + $0x358] sm:$0xff] }
  0xdf   : > { %v583_v52 = vpop.f32.mrf.mxu2  ;;  %v653_v53 = vpop.f32.mrf.mxu3  ;;  %v6219_v54 = vld [vmem:[#allocation2 + $0x19] sm:$0xff]  ;;  %1512 = vmatpush.bf16.msrb.mxu0 %v5591_v45  ;;  %v5640_v45 = vld [vmem:[%s7270_s3 + $0x3a8] sm:$0xff] }
  0xe0   : > { %v6221_v55 = vld [vmem:[#allocation2 + $0x1a] sm:$0xff]  ;;  %691 = vst [vmem:[#allocation2 + $0x28] sm:$0xff] %v683_v48  ;;  %v594_v57 = vmax.f32 %v524_v44, %v583_v52  ;;  %v6227_v58 = vpack.c.bf16 %v6219_v54, %v6213_v49  ;;  %v453_v63 = vpop.f32.mrf.mxu0  ;;  %v515_v0 = vpop.f32.mrf.mxu1  ;;  %1700 = vmatpush.bf16.msrb.mxu2 %v5607_v47  ;;  %v6246_v4 = vpack.c.bf16 %v683_v48, %v6188_v30  ;;  %v5625_v30 = vld [vmem:[%s7270_s3 + $0x330] sm:$0xff]  ;;  %v5624_v44 = vld [vmem:[%s7270_s3 + $0x328] sm:$0xff] }
  0xe1   : > { %v6223_v56 = vld [vmem:[#allocation2 + $0x1b] sm:$0xff]  ;;  %v6231_v59 = vpack.c.bf16 %v6221_v55, %v6215_v50  ;;  %v525_v46 = vmax.f32 %v453_v63, %v515_v0  ;;  %1794 = vmatpush.bf16.msrb.mxu3 %v5615_v61  ;;  %1610 = vmatpush.bf16.msrb.mxu1 %v5595_v12  ;;  %v5648_v47 = vld [vmem:[%s7270_s3 + $0x3e8] sm:$0xff]  ;;  %v5629_v49 = vld [vmem:[%s7270_s3 + $0x350] sm:$0xff] }
  0xe2   : > { %v6235_v60 = vpack.c.bf16 %v6223_v56, %v6217_v51  ;;  %v664_v5 = vmax.f32 %v594_v57, %v653_v53  ;;  %801 = vmatmul.bf16.gmra.mxu0 %v6227_v58  ;;  %1235 = vmatmul.bf16.vlgmr.msra.gmra.mxu1 %v1160_v1  ;;  %v1065_v48 = vld [vmem:[#allocation2 + $0x1c] sm:$0xff]  ;;  %v1064_v57 = vld [vmem:[#allocation2 + $0x14] sm:$0xff]  ;;  %v5628_v1 = vld [vmem:[%s7270_s3 + $0x348] sm:$0xff] }
  0xe3   : > { %958 = vmatmul.bf16.gmra.mxu2 %v6231_v59  ;;  %1513 = vmatpush.bf16.msrb.mxu0 %v5590_v6  ;;  %v5623_v52 = vld [vmem:[%s7270_s3 + $0x320] sm:$0xff]  ;;  %v6361_v62 = vpack.c.bf16 %v1065_v48, %v1064_v57  ;;  %v1536_v6 = vpack.c.bf16 %v1064_v57, %v6294_v28  ;;  %v5637_v12 = vld [vmem:[%s7270_s3 + $0x390] sm:$0xff] }
  0xe4   : > { %1052 = vmatmul.bf16.gmra.mxu3 %v6235_v60  ;;  %v6258_v29 = vadd.f32 %v6043_v2, %v664_v5  ;;  %1701 = vmatpush.bf16.msrb.mxu2 %v5606_v7  ;;  %v5639_v53 = vld [vmem:[%s7270_s3 + $0x3a0] sm:$0xff]  ;;  %v5638_v7 = vld [vmem:[%s7270_s3 + $0x398] sm:$0xff] }
  0xe5   : > { %1795 = vmatpush.bf16.msrb.mxu3 %v5614_v8  ;;  %1979 = vmatpush.bf16.msra.mxu1 %v5634_v16  ;;  %v5647_v0 = vld [vmem:[%s7270_s3 + $0x3e0] sm:$0xff]  ;;  %v5621_v8 = vld [vmem:[%s7270_s3 + $0x310] sm:$0xff]  ;;  %v5620_v16 = vld [vmem:[%s7270_s3 + $0x308] sm:$0xff] }
  0xe6   : > { %v684_v15 = vmax.f32 %v6258_v29, 0.0  ;;  %v5651_v57 = vld [vmem:[%s7270_s3 + $0x400] sm:$0xff]  ;;  %v5710_v29 = vld [vmem:[%s7270_s3 + $0x5d8] sm:$0xff] }
  0xe7   : > { %v585_v17 = vpop.f32.mrf.mxu2  ;;  %v655_v18 = vpop.f32.mrf.mxu3  ;;  %1514 = vmatpush.bf16.msrb.mxu0 %v5589_v13  ;;  %v6351_v50 = vld [vmem:[#allocation2 + $0x21] sm:$0xff]  ;;  %v5666_v13 = vld [vmem:[%s7270_s3 + $0x478] sm:$0xff] }
  0xe8   : > { %692 = vst [vmem:[#allocation2 + $0x30] sm:$0xff] %v684_v15  ;;  %v595_v20 = vmax.f32 %v525_v46, %v585_v17  ;;  %1702 = vmatpush.bf16.msrb.mxu2 %v5605_v14  ;;  %v6359_v61 = vld [vmem:[#allocation2 + $0x22] sm:$0xff]  ;;  %v1255_v63 = vpack.c.bf16 %v6351_v50, %v6219_v54  ;;  %v5622_v54 = vld [vmem:[%s7270_s3 + $0x318] sm:$0xff]  ;;  %v5645_v14 = vld [vmem:[%s7270_s3 + $0x3d0] sm:$0xff] }
  0xe9   : > { %1796 = vmatpush.bf16.msrb.mxu3 %v5613_v21  ;;  %1980 = vmatpush.bf16.msra.mxu1 %v5633_v25  ;;  %v1349_v5 = vpack.c.bf16 %v6359_v61, %v6221_v55  ;;  %v5646_v55 = vld [vmem:[%s7270_s3 + $0x3d8] sm:$0xff]  ;;  %v5627_v46 = vld [vmem:[%s7270_s3 + $0x340] sm:$0xff]  ;;  %v5636_v17 = vld [vmem:[%s7270_s3 + $0x388] sm:$0xff] }
  0xea   : > { %v665_v24 = vmax.f32 %v595_v20, %v655_v18  ;;  %v5665_v18 = vld [vmem:[%s7270_s3 + $0x470] sm:$0xff]  ;;  %v5644_v20 = vld [vmem:[%s7270_s3 + $0x3c8] sm:$0xff]  ;;  %v5619_v21 = vld [vmem:[%s7270_s3 + $0x300] sm:$0xff] }
  0xeb   : > { %1515 = vmatpush.bf16.msrb.mxu0 %v5588_v22  ;;  %v5635_v22 = vld [vmem:[%s7270_s3 + $0x380] sm:$0xff] }
  0xec   : > { %v677_v26 = vadd.f32 %v6043_v2, %v665_v24  ;;  %1703 = vmatpush.bf16.msrb.mxu2 %v5604_v23  ;;  %v1062_v2 = vld [vmem:[#allocation2 + $0x4] sm:$0xff]  ;;  %v1442_v24 = vpack.c.bf16 %v6217_v51, %v6152_v11  ;;  %v5658_v11 = vld [vmem:[%s7270_s3 + $0x438] sm:$0xff] }
  0xed   : > { %v1066_v34 = vpack.c.bf16 %v6294_v28, %v1062_v2  ;;  %1797 = vmatpush.bf16.msrb.mxu3 %v5612_v27  ;;  %1981 = vmatpush.bf16.msra.mxu1 %v5632_v37  ;;  %v6417_v23 = vld [vmem:[#allocation2 + $0x24] sm:$0xff]  ;;  %v5674_v51 = vld [vmem:[%s7270_s3 + $0x4b8] sm:$0xff]  ;;  %v5661_v37 = vld [vmem:[%s7270_s3 + $0x450] sm:$0xff] }
  0xee   : > { %v685_v33 = vmax.f32 %v677_v26, 0.0  ;;  %v5643_v25 = vld [vmem:[%s7270_s3 + $0x3c0] sm:$0xff]  ;;  %v5664_v26 = vld [vmem:[%s7270_s3 + $0x468] sm:$0xff]  ;;  %v6428_v27 = vpack.c.bf16 %v6417_v23, %v1065_v48  ;;  %v5682_v28 = vld [vmem:[%s7270_s3 + $0x4f8] sm:$0xff] }
  0xef   : > { %1516 = vmatpush.bf16.msrb.mxu0 %v5587_v31  ;;  %v5821_v31 = vmov 0.0   ;;  %v5662_v2 = vld [vmem:[%s7270_s3 + $0x458] sm:$0xff]  ;;  %v5652_v48 = vld [vmem:[%s7270_s3 + $0x408] sm:$0xff] }
  0xf0   : > { %693 = vst [vmem:[#allocation2 + $0x38] sm:$0xff] %v685_v33  ;;  %1704 = vmatpush.bf16.msrb.mxu2 %v5603_v32  ;;  %v5673_v32 = vld [vmem:[%s7270_s3 + $0x4b0] sm:$0xff] }
  0xf1   : > { %1798 = vmatpush.bf16.msrb.mxu3 %v5611_v36  ;;  %1982 = vmatpush.bf16.msra.mxu1 %v5631_v3  ;;  %694 = vst [vmem:[#allocation2 + $0x40] sm:$0xff] %v5821_v31  ;;  %v5681_v33 = vld [vmem:[%s7270_s3 + $0x4f0] sm:$0xff]  ;;  %v5680_v36 = vld [vmem:[%s7270_s3 + $0x4e8] sm:$0xff]  ;;  %v5679_v3 = vld [vmem:[%s7270_s3 + $0x4e0] sm:$0xff] }
  0xf2   : > { %1141 = vmatmul.bf16.vlgmr.msra.gmra.mxu0 %v1066_v34  ;;  %1240 = vmatmul.bf16.gmra.mxu1 %v1161_v39  ;;  %v5656_v34 = vld [vmem:[%s7270_s3 + $0x428] sm:$0xff]  ;;  %v5655_v39 = vld [vmem:[%s7270_s3 + $0x420] sm:$0xff] }
  0xf3   : > { %1329 = vmatmul.bf16.vlgmr.msra.gmra.mxu2 %v1254_v35  ;;  %1885 = vmatpush.bf16.msra.mxu0 %v5626_v9  ;;  %v5672_v35 = vld [vmem:[%s7270_s3 + $0x4a8] sm:$0xff]  ;;  %v5671_v9 = vld [vmem:[%s7270_s3 + $0x4a0] sm:$0xff] }
  0xf4   : > { %1423 = vmatmul.bf16.vlgmr.msra.gmra.mxu3 %v1348_v38  ;;  %2073 = vmatpush.bf16.msra.mxu2 %v5642_v40  ;;  %v6469_v38 = vld [vmem:[#allocation2 + $0x23] sm:$0xff] }
  0xf5   : > { %2167 = vmatpush.bf16.msra.mxu3 %v5650_v10  ;;  %1983 = vmatpush.bf16.msra.mxu1 %v5630_v43  ;;  %v6477_v40 = vld [vmem:[#allocation2 + $0x29] sm:$0xff]  ;;  %v1443_v10 = vpack.c.bf16 %v6469_v38, %v6223_v56  ;;  %v5654_v56 = vld [vmem:[%s7270_s3 + $0x418] sm:$0xff] }
  0xf6   : > { %v5678_v43 = vld [vmem:[%s7270_s3 + $0x4d8] sm:$0xff] }
  0xf7   : > { %1886 = vmatpush.bf16.msra.mxu0 %v5625_v30  ;;  %v5660_v30 = vld [vmem:[%s7270_s3 + $0x448] sm:$0xff] }
  0xf8   : > { %2074 = vmatpush.bf16.msra.mxu2 %v5641_v41  ;;  %v1725_v41 = vpack.c.bf16 %v6477_v40, %v6351_v50 }
  0xf9   : > { %2168 = vmatpush.bf16.msra.mxu3 %v5649_v42  ;;  %1984 = vmatpush.bf16.msra.mxu1 %v5629_v49  ;;  %v5670_v42 = vld [vmem:[%s7270_s3 + $0x498] sm:$0xff]  ;;  %v5668_v49 = vld [vmem:[%s7270_s3 + $0x488] sm:$0xff] }
  0xfb   : > { %1887 = vmatpush.bf16.msra.mxu0 %v5624_v44  ;;  %v5669_v44 = vld [vmem:[%s7270_s3 + $0x490] sm:$0xff] }
  0xfc   : > { %2075 = vmatpush.bf16.msra.mxu2 %v5640_v45  ;;  %v5698_v45 = vld [vmem:[%s7270_s3 + $0x578] sm:$0xff] }
  0xfd   : > { %2169 = vmatpush.bf16.msra.mxu3 %v5648_v47  ;;  %1985 = vmatpush.bf16.msra.mxu1 %v5628_v1  ;;  %v5677_v47 = vld [vmem:[%s7270_s3 + $0x4d0] sm:$0xff]  ;;  %v5667_v1 = vld [vmem:[%s7270_s3 + $0x480] sm:$0xff] }
  0xff   : > { %1888 = vmatpush.bf16.msra.mxu0 %v5623_v52  ;;  %v5697_v52 = vld [vmem:[%s7270_s3 + $0x570] sm:$0xff] }
 0x100   : > { %2076 = vmatpush.bf16.msra.mxu2 %v5639_v53  ;;  %v5676_v53 = vld [vmem:[%s7270_s3 + $0x4c8] sm:$0xff] }
 0x101   : > { %2170 = vmatpush.bf16.msra.mxu3 %v5647_v0  ;;  %1986 = vmatpush.bf16.msra.mxu1 %v5627_v46  ;;  %v6532_v0 = vld [vmem:[#allocation2 + $0x2b] sm:$0xff]  ;;  %v5690_v46 = vld [vmem:[%s7270_s3 + $0x538] sm:$0xff] }
 0x102   : > { %1146 = vmatmul.bf16.gmra.mxu0 %v6361_v62  ;;  %1611 = vmatmul.bf16.vlgmr.msrb.gmra.mxu1 %v1536_v6  ;;  %v5675_v6 = vld [vmem:[%s7270_s3 + $0x4c0] sm:$0xff] }
 0x103   : > { %1334 = vmatmul.bf16.gmra.mxu2 %v1255_v63  ;;  %1889 = vmatpush.bf16.msra.mxu0 %v5622_v54  ;;  %v6530_v63 = vld [vmem:[#allocation2 + $0x20] sm:$0xff]  ;;  %v5696_v54 = vld [vmem:[%s7270_s3 + $0x568] sm:$0xff] }
 0x104   : > { %1428 = vmatmul.bf16.gmra.mxu3 %v1349_v5  ;;  %2077 = vmatpush.bf16.msra.mxu2 %v5638_v7  ;;  %v2096_v5 = vld [vmem:[#allocation2 + $0x18] sm:$0xff] }
 0x105   : > { %2171 = vmatpush.bf16.msra.mxu3 %v5646_v55  ;;  %2355 = vmatpush.bf16.msrb.mxu1 %v5666_v13  ;;  %v2100_v7 = vpack.c.bf16 %v6530_v63, %v2096_v5  ;;  %v6546_v55 = vpack.c.bf16 %v6532_v0, %v6469_v38  ;;  %v5705_v13 = vld [vmem:[%s7270_s3 + $0x5b0] sm:$0xff] }
 0x106   : > { %v5721_v5 = vld [vmem:[%s7270_s3 + $0x630] sm:$0xff] }
 0x107   : > { %1890 = vmatpush.bf16.msra.mxu0 %v5621_v8  ;;  %v5706_v8 = vld [vmem:[%s7270_s3 + $0x5b8] sm:$0xff] }
 0x108   : > { %2078 = vmatpush.bf16.msra.mxu2 %v5637_v12  ;;  %v5714_v12 = vld [vmem:[%s7270_s3 + $0x5f8] sm:$0xff] }
 0x109   : > { %2172 = vmatpush.bf16.msra.mxu3 %v5645_v14  ;;  %2356 = vmatpush.bf16.msrb.mxu1 %v5665_v18  ;;  %v5713_v14 = vld [vmem:[%s7270_s3 + $0x5f0] sm:$0xff]  ;;  %v5704_v18 = vld [vmem:[%s7270_s3 + $0x5a8] sm:$0xff] }
 0x10b   : > { %1891 = vmatpush.bf16.msra.mxu0 %v5620_v16  ;;  %v5694_v16 = vld [vmem:[%s7270_s3 + $0x558] sm:$0xff] }
 0x10c   : > { %2079 = vmatpush.bf16.msra.mxu2 %v5636_v17  ;;  %v5688_v17 = vld [vmem:[%s7270_s3 + $0x528] sm:$0xff] }
 0x10d   : > { %2173 = vmatpush.bf16.msra.mxu3 %v5644_v20  ;;  %2357 = vmatpush.bf16.msrb.mxu1 %v5664_v26  ;;  %v5712_v20 = vld [vmem:[%s7270_s3 + $0x5e8] sm:$0xff] }
 0x10f   : > { %1892 = vmatpush.bf16.msra.mxu0 %v5619_v21  ;;  %v5693_v21 = vld [vmem:[%s7270_s3 + $0x550] sm:$0xff] }
 0x110   : > { %2080 = vmatpush.bf16.msra.mxu2 %v5635_v22  ;;  %v6587_v22 = vld [vmem:[#allocation2 + $0x2a] sm:$0xff] }
 0x111   : > { %2174 = vmatpush.bf16.msra.mxu3 %v5643_v25  ;;  %v6591_v25 = vld [vmem:[#allocation2 + $0x28] sm:$0xff] }
 0x112   : > { %1517 = vmatmul.bf16.vlgmr.msrb.gmra.mxu0 %v1442_v24  ;;  %1616 = vmatmul.bf16.gmra.mxu1 %v6428_v27  ;;  %v6589_v24 = vld [vmem:[#allocation2 + $0x2c] sm:$0xff] }
 0x113   : > { %1705 = vmatmul.bf16.vlgmr.msrb.gmra.mxu2 %v6163_v19  ;;  %v5663_v19 = vld [vmem:[%s7270_s3 + $0x460] sm:$0xff]  ;;  %2261 = vmatpush.bf16.msrb.mxu0 %v5658_v11  ;;  %v2007_v31 = vpack.c.bf16 %v6589_v24, %v6417_v23  ;;  %v5686_v23 = vld [vmem:[%s7270_s3 + $0x518] sm:$0xff] }
 0x114   : > { %1799 = vmatmul.bf16.vlgmr.msrb.gmra.mxu3 %v6227_v58  ;;  %2449 = vmatpush.bf16.msrb.mxu2 %v5674_v51  ;;  %v5657_v58 = vld [vmem:[%s7270_s3 + $0x430] sm:$0xff]  ;;  %v5687_v11 = vld [vmem:[%s7270_s3 + $0x520] sm:$0xff] }
 0x115   : > { %2543 = vmatpush.bf16.msrb.mxu3 %v5682_v28  ;;  %2358 = vmatpush.bf16.msrb.mxu1 %v5663_v19  ;;  %v5703_v51 = vld [vmem:[%s7270_s3 + $0x5a0] sm:$0xff]  ;;  %v1819_v28 = vpack.c.bf16 %v6587_v22, %v6359_v61 }
 0x116   : > { %v2284_v19 = vld [vmem:[#allocation2 + $0x1a] sm:$0xff] }
 0x117   : > { %2262 = vmatpush.bf16.msrb.mxu0 %v5657_v58  ;;  %v5711_v58 = vld [vmem:[%s7270_s3 + $0x5e0] sm:$0xff] }
 0x118   : > { %2450 = vmatpush.bf16.msrb.mxu2 %v5673_v32  ;;  %v5692_v32 = vld [vmem:[%s7270_s3 + $0x548] sm:$0xff] }
 0x119   : > { %2544 = vmatpush.bf16.msrb.mxu3 %v5681_v33  ;;  %2359 = vmatpush.bf16.msrb.mxu1 %v5662_v2  ;;  %v2101_v33 = vpack.c.bf16 %v684_v15, %v6591_v25  ;;  %v2288_v2 = vpack.c.bf16 %v6359_v61, %v2284_v19  ;;  %v5691_v15 = vld [vmem:[%s7270_s3 + $0x540] sm:$0xff]  ;;  %v5716_v19 = vld [vmem:[%s7270_s3 + $0x608] sm:$0xff] }
 0x11b   : > { %2263 = vmatpush.bf16.msrb.mxu0 %v5656_v34  ;;  %v5702_v34 = vld [vmem:[%s7270_s3 + $0x598] sm:$0xff] }
 0x11c   : > { %2451 = vmatpush.bf16.msrb.mxu2 %v5672_v35  ;;  %v5685_v35 = vld [vmem:[%s7270_s3 + $0x510] sm:$0xff] }
 0x11d   : > { %2545 = vmatpush.bf16.msrb.mxu3 %v5680_v36  ;;  %2360 = vmatpush.bf16.msrb.mxu1 %v5661_v37  ;;  %v5701_v36 = vld [vmem:[%s7270_s3 + $0x590] sm:$0xff] }
 0x11e   : > { %v5709_v37 = vld [vmem:[%s7270_s3 + $0x5d0] sm:$0xff] }
 0x11f   : > { %2264 = vmatpush.bf16.msrb.mxu0 %v5655_v39  ;;  %v5684_v39 = vld [vmem:[%s7270_s3 + $0x508] sm:$0xff] }
 0x120   : > { %2452 = vmatpush.bf16.msrb.mxu2 %v5671_v9  ;;  %v5700_v9 = vld [vmem:[%s7270_s3 + $0x588] sm:$0xff] }
 0x121   : > { %2546 = vmatpush.bf16.msrb.mxu3 %v5679_v3  ;;  %2361 = vmatpush.bf16.msrb.mxu1 %v5660_v30  ;;  %v2190_v3 = vld [vmem:[#allocation2 + $0x19] sm:$0xff] }
 0x122   : > { %1522 = vmatmul.bf16.gmra.mxu0 %v1443_v10  ;;  %1987 = vmatmul.bf16.vlgmr.msra.gmra.mxu1 %v6235_v60  ;;  %v5653_v60 = vld [vmem:[%s7270_s3 + $0x410] sm:$0xff]  ;;  %v5708_v10 = vld [vmem:[%s7270_s3 + $0x5c8] sm:$0xff] }
 0x123   : > { %1710 = vmatmul.bf16.gmra.mxu2 %v6246_v4  ;;  %v5659_v4 = vld [vmem:[%s7270_s3 + $0x440] sm:$0xff]  ;;  %2265 = vmatpush.bf16.msrb.mxu0 %v5654_v56  ;;  %v6645_v30 = vld [vmem:[#allocation2 + $0x32] sm:$0xff] }
 0x124   : > { %1804 = vmatmul.bf16.gmra.mxu3 %v1725_v41  ;;  %2453 = vmatpush.bf16.msrb.mxu2 %v5670_v42  ;;  %v2378_v56 = vld [vmem:[#allocation2 + $0x1b] sm:$0xff] }
 0x125   : > { %2547 = vmatpush.bf16.msrb.mxu3 %v5678_v43  ;;  %2362 = vmatpush.bf16.msrb.mxu1 %v5659_v4  ;;  %v5683_v42 = vld [vmem:[%s7270_s3 + $0x500] sm:$0xff] }
 0x126   : > { %v5699_v43 = vld [vmem:[%s7270_s3 + $0x580] sm:$0xff] }
 0x127   : > { %2266 = vmatpush.bf16.msrb.mxu0 %v5653_v60  ;;  %v2194_v60 = vpack.c.bf16 %v6351_v50, %v2190_v3  ;;  %v5722_v50 = vld [vmem:[%s7270_s3 + $0x638] sm:$0xff] }
 0x128   : > { %2454 = vmatpush.bf16.msrb.mxu2 %v5669_v44  ;;  %v2382_v44 = vpack.c.bf16 %v6469_v38, %v2378_v56 }
 0x129   : > { %2731 = vmatpush.bf16.msra.mxu1 %v5698_v45  ;;  %2548 = vmatpush.bf16.msrb.mxu3 %v5677_v47  ;;  %v5707_v47 = vld [vmem:[%s7270_s3 + $0x5c0] sm:$0xff] }
 0x12b   : > { %2267 = vmatpush.bf16.msrb.mxu0 %v5652_v48  ;;  %v2289_v48 = vpack.c.bf16 %v6645_v30, %v6587_v22 }
 0x12c   : > { %2455 = vmatpush.bf16.msrb.mxu2 %v5668_v49 }
 0x12d   : > { %2732 = vmatpush.bf16.msra.mxu1 %v5697_v52  ;;  %2549 = vmatpush.bf16.msrb.mxu3 %v5676_v53 }
 0x12f   : > { %2268 = vmatpush.bf16.msrb.mxu0 %v5651_v57 }
 0x130   : > { %2456 = vmatpush.bf16.msrb.mxu2 %v5667_v1 }
 0x131   : > { %2550 = vmatpush.bf16.msrb.mxu3 %v5675_v6  ;;  %2733 = vmatpush.bf16.msra.mxu1 %v5696_v54  ;;  %v2193_v54 = vld [vmem:[#allocation2 + $0x31] sm:$0xff] }
 0x132   : > { %1893 = vmatmul.bf16.vlgmr.msra.gmra.mxu0 %v6231_v59  ;;  %1992 = vmatmul.bf16.gmra.mxu1 %v6546_v55  ;;  %v5695_v59 = vld [vmem:[%s7270_s3 + $0x560] sm:$0xff] }
 0x133   : > { %2081 = vmatmul.bf16.vlgmr.msra.gmra.mxu2 %v6361_v62  ;;  %2637 = vmatpush.bf16.msra.mxu0 %v5690_v46  ;;  %v5689_v62 = vld [vmem:[%s7270_s3 + $0x530] sm:$0xff] }
 0x134   : > { %2175 = vmatmul.bf16.vlgmr.msra.gmra.mxu3 %v2100_v7  ;;  %2825 = vmatpush.bf16.msra.mxu2 %v5706_v8  ;;  %v6672_v7 = vld [vmem:[#allocation2 + $0x33] sm:$0xff] }
 0x135   : > { %2919 = vmatpush.bf16.msra.mxu3 %v5714_v12  ;;  %2734 = vmatpush.bf16.msra.mxu1 %v5695_v59  ;;  %v6674_v8 = vld [vmem:[#allocation2 + $0x34] sm:$0xff] }
 0x137   : > { %2638 = vmatpush.bf16.msra.mxu0 %v5689_v62  ;;  %v2195_v62 = vpack.c.bf16 %v2193_v54, %v6477_v40 }
 0x138   : > { %2826 = vmatpush.bf16.msra.mxu2 %v5705_v13  ;;  %v2383_v13 = vpack.c.bf16 %v6672_v7, %v6532_v0  ;;  %v5718_v0 = vld [vmem:[%s7270_s3 + $0x618] sm:$0xff] }
 0x139   : > { %2920 = vmatpush.bf16.msra.mxu3 %v5713_v14  ;;  %2735 = vmatpush.bf16.msra.mxu1 %v5694_v16  ;;  %v2660_v16 = vld [vmem:[#allocation2 + $0x21] sm:$0xff] }
 0x13b   : > { %2639 = vmatpush.bf16.msra.mxu0 %v5688_v17  ;;  %v5719_v17 = vld [vmem:[%s7270_s3 + $0x620] sm:$0xff] }
 0x13c   : > { %2827 = vmatpush.bf16.msra.mxu2 %v5704_v18  ;;  %v2477_v18 = vpack.c.bf16 %v6674_v8, %v6589_v24 }
 0x13d   : > { %2921 = vmatpush.bf16.msra.mxu3 %v5712_v20  ;;  %2736 = vmatpush.bf16.msra.mxu1 %v5693_v21  ;;  %v2664_v20 = vpack.c.bf16 %v6477_v40, %v2660_v16 }
 0x13f   : > { %v864_v26 = vpop.f32.mrf.mxu1  ;;  %2640 = vmatpush.bf16.msra.mxu0 %v5687_v11 }
 0x140   : > { %2828 = vmatpush.bf16.msra.mxu2 %v5703_v51 }
 0x141   : > { %2922 = vmatpush.bf16.msra.mxu3 %v5711_v58  ;;  %2737 = vmatpush.bf16.msra.mxu1 %v5692_v32 }
 0x142   : > { %1898 = vmatmul.bf16.gmra.mxu0 %v1819_v28  ;;  %2363 = vmatmul.bf16.vlgmr.msrb.gmra.mxu1 %v2288_v2 }
 0x143   : > { %2086 = vmatmul.bf16.gmra.mxu2 %v2007_v31  ;;  %2641 = vmatpush.bf16.msra.mxu0 %v5686_v23  ;;  %v5717_v31 = vld [vmem:[%s7270_s3 + $0x610] sm:$0xff]  ;;  %v2754_v23 = vld [vmem:[#allocation2 + $0x22] sm:$0xff] }
 0x144   : > { %2180 = vmatmul.bf16.gmra.mxu3 %v2101_v33  ;;  %2829 = vmatpush.bf16.msra.mxu2 %v5702_v34  ;;  %v2663_v33 = vld [vmem:[#allocation2 + $0x39] sm:$0xff] }
 0x145   : > { %2923 = vmatpush.bf16.msra.mxu3 %v5710_v29  ;;  %2738 = vmatpush.bf16.msra.mxu1 %v5691_v15  ;;  %v2570_v15 = vpack.c.bf16 %v6591_v25, %v6530_v63 }
 0x147   : > { %v6625_v61 = vpop.f32.mrf.mxu1  ;;  %2642 = vmatpush.bf16.msra.mxu0 %v5685_v35  ;;  %v2758_v35 = vpack.c.bf16 %v6587_v22, %v2754_v23 }
 0x148   : > { %2830 = vmatpush.bf16.msra.mxu2 %v5701_v36  ;;  %v5715_v36 = vld [vmem:[%s7270_s3 + $0x600] sm:$0xff] }
 0x149   : > { %2924 = vmatpush.bf16.msra.mxu3 %v5709_v37  ;;  %v2665_v37 = vpack.c.bf16 %v2663_v33, %v2193_v54 }
 0x14b   : > { %2643 = vmatpush.bf16.msra.mxu0 %v5684_v39 }
 0x14c   : > { %2831 = vmatpush.bf16.msra.mxu2 %v5700_v9 }
 0x14d   : > { %2925 = vmatpush.bf16.msra.mxu3 %v5708_v10 }
 0x14f   : > { %v797_v41 = vpop.f32.mrf.mxu0  ;;  %v869_v45 = vpop.f32.mrf.mxu1  ;;  %2644 = vmatpush.bf16.msra.mxu0 %v5683_v42 }
 0x150   : > { %v865_v4 = vadd.f32 %v864_v26, %v797_v41  ;;  %2832 = vmatpush.bf16.msra.mxu2 %v5699_v43  ;;  %v2568_v43 = vld [vmem:[#allocation2 + $0x30] sm:$0xff] }
 0x151   : > { %2926 = vmatpush.bf16.msra.mxu3 %v5707_v47 }
 0x152   : > { %2269 = vmatmul.bf16.vlgmr.msrb.gmra.mxu0 %v2194_v60  ;;  %2368 = vmatmul.bf16.gmra.mxu1 %v2289_v48 }
 0x153   : > { %2457 = vmatmul.bf16.vlgmr.msrb.gmra.mxu2 %v2382_v44  ;;  %3013 = vmatpush.bf16.msrb.mxu0 %v5722_v50  ;;  %v2757_v44 = vld [vmem:[#allocation2 + $0x3a] sm:$0xff] }
 0x154   : > { %2551 = vmatmul.bf16.vlgmr.msrb.gmra.mxu3 %v6428_v27  ;;  %v5720_v27 = vld [vmem:[%s7270_s3 + $0x628] sm:$0xff]  ;;  %v2851_v50 = vld [vmem:[#allocation2 + $0x3b] sm:$0xff] }
 0x156   : > { %v954_v38 = vpop.f32.mrf.mxu2 }
 0x157   : > { %v964_v49 = vadd.f32 %v954_v38, %v865_v4  ;;  %v1048_v52 = vpop.f32.mrf.mxu3  ;;  %v799_v53 = vpop.f32.mrf.mxu0  ;;  %3014 = vmatpush.bf16.msrb.mxu0 %v5721_v5  ;;  %v2569_v4 = vld [vmem:[#allocation2 + $0x38] sm:$0xff]  ;;  %v2853_v5 = vpack.c.bf16 %v2851_v50, %v6672_v7 }
 0x158   : > { %v6664_v1 = vpop.f32.mrf.mxu1  ;;  %v867_v34 = vadd.f32 %v6625_v61, %v799_v53  ;;  %v2571_v38 = vpack.c.bf16 %v2569_v4, %v2568_v43 }
 0x159   : > { %v1058_v57 = vadd.f32 %v1048_v52, %v964_v49 }
 0x15b   : > { %3015 = vmatpush.bf16.msrb.mxu0 %v5720_v27 }
 0x15e   : > { %v956_v6 = vpop.f32.mrf.mxu2 }
 0x15f   : > { %v1050_v46 = vpop.f32.mrf.mxu3  ;;  %v802_v12 = vpop.f32.mrf.mxu0  ;;  %3016 = vmatpush.bf16.msrb.mxu0 %v5719_v17  ;;  %v965_v39 = vadd.f32 %v956_v6, %v867_v34  ;;  %v2945_v34 = vld [vmem:[#allocation2 + $0x3c] sm:$0xff] }
 0x160   : > { %v870_v59 = vadd.f32 %v869_v45, %v802_v12  ;;  %v1236_v14 = vpop.f32.mrf.mxu1 }
 0x161   : > { %v1059_v3 = vadd.f32 %v1050_v46, %v965_v39 }
 0x162   : > { %2274 = vmatmul.bf16.gmra.mxu0 %v2195_v62  ;;  %2739 = vmatmul.bf16.vlgmr.msra.gmra.mxu1 %v2664_v20 }
 0x163   : > { %2462 = vmatmul.bf16.gmra.mxu2 %v2383_v13  ;;  %3017 = vmatpush.bf16.msrb.mxu0 %v5718_v0  ;;  %v2942_v0 = vld [vmem:[#allocation2 + $0x24] sm:$0xff] }
 0x164   : > { %2556 = vmatmul.bf16.gmra.mxu3 %v2477_v18 }
 0x166   : > { %v959_v21 = vpop.f32.mrf.mxu2 }
 0x167   : > { %v966_v26 = vadd.f32 %v959_v21, %v870_v59  ;;  %v1053_v11 = vpop.f32.mrf.mxu3  ;;  %v804_v51 = vpop.f32.mrf.mxu0  ;;  %3018 = vmatpush.bf16.msrb.mxu0 %v5717_v31 }
 0x168   : > { %v1238_v40 = vpop.f32.mrf.mxu1  ;;  %v872_v49 = vadd.f32 %v6664_v1, %v804_v51 }
 0x169   : > { %v1060_v28 = vadd.f32 %v1053_v11, %v966_v26  ;;  %v2946_v26 = vpack.c.bf16 %v6589_v24, %v2942_v0  ;;  %v2947_v24 = vpack.c.bf16 %v2945_v34, %v6674_v8 }
 0x16b   : > { %3019 = vmatpush.bf16.msrb.mxu0 %v5716_v19 }
 0x16e   : > { %v961_v58 = vpop.f32.mrf.mxu2 }
 0x16f   : > { %v1055_v32 = vpop.f32.mrf.mxu3  ;;  %v1142_v2 = vpop.f32.mrf.mxu0  ;;  %3020 = vmatpush.bf16.msrb.mxu0 %v5715_v36  ;;  %v967_v27 = vadd.f32 %v961_v58, %v872_v49 }
 0x170   : > { %v1152_v29 = vadd.f32 %v1142_v2, %v1058_v57  ;;  %v1241_v61 = vpop.f32.mrf.mxu1  ;;  %v2759_v57 = vpack.c.bf16 %v2757_v44, %v6645_v30 }
 0x171   : > { %v1061_v46 = vadd.f32 %v1055_v32, %v967_v27 }
 0x172   : > { %2645 = vmatmul.bf16.vlgmr.msra.gmra.mxu0 %v2570_v15  ;;  %v1246_v9 = vadd.f32 %v1236_v14, %v1152_v29  ;;  %2744 = vmatmul.bf16.gmra.mxu1 %v2665_v37 }
 0x173   : > { %2833 = vmatmul.bf16.vlgmr.msra.gmra.mxu2 %v2758_v35 }
 0x174   : > { %2927 = vmatmul.bf16.vlgmr.msra.gmra.mxu3 %v6546_v55 }
 0x176   : > { %v1330_v10 = vpop.f32.mrf.mxu2 }
 0x177   : > { %v1340_v63 = vadd.f32 %v1330_v10, %v1246_v9  ;;  %v1424_v25 = vpop.f32.mrf.mxu3  ;;  %v1144_v22 = vpop.f32.mrf.mxu0 }
 0x178   : > { %v1153_v56 = vadd.f32 %v1144_v22, %v1059_v3  ;;  %v1243_v48 = vpop.f32.mrf.mxu1 }
 0x179   : > { %v1434_v41 = vadd.f32 %v1424_v25, %v1340_v63 }
 0x17a   : > { %v1247_v42 = vadd.f32 %v1238_v40, %v1153_v56 }
 0x17e   : > { %v1332_v60 = vpop.f32.mrf.mxu2 }
 0x17f   : > { %v1341_v45 = vadd.f32 %v1332_v60, %v1247_v42  ;;  %v1426_v47 = vpop.f32.mrf.mxu3  ;;  %v1147_v55 = vpop.f32.mrf.mxu0 }
 0x180   : > { %v1154_v53 = vadd.f32 %v1147_v55, %v1060_v28  ;;  %v1612_v16 = vpop.f32.mrf.mxu1 }
 0x181   : > { %v1435_v52 = vadd.f32 %v1426_v47, %v1341_v45 }
 0x182   : > { %2650 = vmatmul.bf16.gmra.mxu0 %v2571_v38  ;;  %v1248_v6 = vadd.f32 %v1241_v61, %v1154_v53 }
 0x183   : > { %2838 = vmatmul.bf16.gmra.mxu2 %v2759_v57 }
 0x184   : > { %2932 = vmatmul.bf16.gmra.mxu3 %v2853_v5 }
 0x186   : > { %v1335_v54 = vpop.f32.mrf.mxu2 }
 0x187   : > { %v1342_v12 = vadd.f32 %v1335_v54, %v1248_v6  ;;  %v1429_v59 = vpop.f32.mrf.mxu3  ;;  %v1149_v62 = vpop.f32.mrf.mxu0 }
 0x188   : > { %v1155_v14 = vadd.f32 %v1149_v62, %v1061_v46  ;;  %v1614_v11 = vpop.f32.mrf.mxu1 }
 0x189   : > { %v1436_v13 = vadd.f32 %v1429_v59, %v1342_v12 }
 0x18a   : > { %v1249_v1 = vadd.f32 %v1243_v48, %v1155_v14 }
 0x18e   : > { %v1337_v17 = vpop.f32.mrf.mxu2 }
 0x18f   : > { %v1343_v18 = vadd.f32 %v1337_v17, %v1249_v1  ;;  %v1431_v20 = vpop.f32.mrf.mxu3  ;;  %v1518_v30 = vpop.f32.mrf.mxu0 }
 0x190   : > { %v1528_v21 = vadd.f32 %v1518_v30, %v1434_v41  ;;  %v1617_v2 = vpop.f32.mrf.mxu1  ;;  %v5737_v30 = vld [vmem:[%s7272_s5 + $0x74] sm:$0xf] }
 0x191   : > { %v1437_v7 = vadd.f32 %v1431_v20, %v1343_v18  ;;  %v5186_v18 = vld [vmem:[%s7272_s5 + $0x70] sm:$0xf]  ;;  %v5738_v20 = vld [vmem:[%s7272_s5 + $0x74] sm:$0xf0] }
 0x192   : > { %3021 = vmatmul.bf16.vlgmr.msrb.gmra.mxu0 %v2946_v26  ;;  %v1622_v51 = vadd.f32 %v1612_v16, %v1528_v21  ;;  %v5187_v0 = vor.u32 %v5738_v20, %v5186_v18  ;;  %v5266_v21 = vld [vmem:[%s7272_s5 + $0xf0] sm:$0xf]  ;;  %v5754_v26 = vld [vmem:[%s7272_s5 + $0xf4] sm:$0xf0]  ;;  %v5731_v18 = vld [vmem:[%s7272_s5 + $0x44] sm:$0xf] }
 0x193   : > { %v5164_v20 = vld [vmem:[%s7272_s5 + $0x48] sm:$0xf0] }
 0x194   : > { %3148 = vmatpush.bf16.msrb.mxu1 %v5187_v0 }
 0x196   : > { %v1706_v28 = vpop.f32.mrf.mxu2 }
 0x197   : > { %v1716_v31 = vadd.f32 %v1706_v28, %v1622_v51  ;;  %v1800_v40 = vpop.f32.mrf.mxu3  ;;  %v1520_v19 = vpop.f32.mrf.mxu0  ;;  %v5267_v28 = vor.u32 %v5754_v26, %v5266_v21  ;;  %v5242_v21 = vld [vmem:[%s7272_s5 + $0xc0] sm:$0xf]  ;;  %v5748_v26 = vld [vmem:[%s7272_s5 + $0xc4] sm:$0xf0] }
 0x198   : > { %v1529_v32 = vadd.f32 %v1520_v19, %v1435_v52  ;;  %v1619_v61 = vpop.f32.mrf.mxu1  ;;  %v5178_v19 = vld [vmem:[%s7272_s5 + $0x60] sm:$0xf] }
 0x199   : > { %v1810_v58 = vadd.f32 %v1800_v40, %v1716_v31  ;;  %v5753_v31 = vld [vmem:[%s7272_s5 + $0xf4] sm:$0xf]  ;;  %v5268_v40 = vld [vmem:[%s7272_s5 + $0xf8] sm:$0xf0]  ;;  %3288 = vmatpush.bf16.msrb.mxu3 %v5267_v28 }
 0x19a   : > { %v1623_v33 = vadd.f32 %v1614_v11, %v1529_v32  ;;  %v5271_v32 = vor.u32 %v5753_v31, %v5268_v40  ;;  %v5243_v31 = vor.u32 %v5748_v26, %v5242_v21  ;;  %v5244_v40 = vld [vmem:[%s7272_s5 + $0xc8] sm:$0xf0]  ;;  %v5138_v26 = vld [vmem:[%s7272_s5 + $0x10] sm:$0xf] }
 0x19c   : > { %3301 = vmatpush.bf16.msra.mxu0 %v5271_v32 }
 0x19e   : > { %v1708_v23 = vpop.f32.mrf.mxu2 }
 0x19f   : > { %v1717_v29 = vadd.f32 %v1708_v23, %v1623_v33  ;;  %v1802_v15 = vpop.f32.mrf.mxu3  ;;  %v1523_v35 = vpop.f32.mrf.mxu0  ;;  %v5736_v33 = vld [vmem:[%s7272_s5 + $0x64] sm:$0xf0]  ;;  %v5180_v23 = vld [vmem:[%s7272_s5 + $0x68] sm:$0xf0] }
 0x1a0   : > { %v1530_v37 = vadd.f32 %v1523_v35, %v1436_v13  ;;  %v6707_v60 = vpop.f32.mrf.mxu1  ;;  %v5179_v34 = vor.u32 %v5736_v33, %v5178_v19  ;;  %v5752_v35 = vld [vmem:[%s7272_s5 + $0xe4] sm:$0xf0] }
 0x1a1   : > { %v1811_v36 = vadd.f32 %v1802_v15, %v1717_v29  ;;  %v5258_v15 = vld [vmem:[%s7272_s5 + $0xe0] sm:$0xf] }
 0x1a2   : > { %3026 = vmatmul.bf16.gmra.mxu0 %v2947_v24  ;;  %v1624_v39 = vadd.f32 %v1617_v2, %v1530_v37  ;;  %v5735_v2 = vld [vmem:[%s7272_s5 + $0x64] sm:$0xf]  ;;  %v5259_v37 = vor.u32 %v5752_v35, %v5258_v15  ;;  %v5260_v24 = vld [vmem:[%s7272_s5 + $0xe8] sm:$0xf0]  ;;  %3149 = vmatpush.bf16.msrb.mxu1 %v5179_v34  ;;  %v5729_v34 = vld [vmem:[%s7272_s5 + $0x34] sm:$0xf] }
 0x1a3   : > { %v5183_v29 = vor.u32 %v5735_v2, %v5180_v23  ;;  %v5154_v2 = vld [vmem:[%s7272_s5 + $0x30] sm:$0xf]  ;;  %v5730_v23 = vld [vmem:[%s7272_s5 + $0x34] sm:$0xf0] }
 0x1a4   : > { %3289 = vmatpush.bf16.msrb.mxu3 %v5259_v37  ;;  %v5746_v15 = vld [vmem:[%s7272_s5 + $0xb4] sm:$0xf0] }
 0x1a6   : > { %v1711_v9 = vpop.f32.mrf.mxu2 }
 0x1a7   : > { %v1718_v10 = vadd.f32 %v1711_v9, %v1624_v39  ;;  %v1805_v3 = vpop.f32.mrf.mxu3  ;;  %v1525_v63 = vpop.f32.mrf.mxu0 }
 0x1a8   : > { %v1531_v22 = vadd.f32 %v1525_v63, %v1437_v7  ;;  %v6717_v55 = vpop.f32.mrf.mxu1  ;;  %v5188_v7 = vld [vmem:[%s7272_s5 + $0x78] sm:$0xf0] }
 0x1a9   : > { %v1812_v25 = vadd.f32 %v1805_v3, %v1718_v10  ;;  %v5191_v51 = vor.u32 %v5737_v30, %v5188_v7  ;;  %v5734_v10 = vld [vmem:[%s7272_s5 + $0x54] sm:$0xf0]  ;;  %v5733_v3 = vld [vmem:[%s7272_s5 + $0x54] sm:$0xf]  ;;  %v5167_v7 = vor.u32 %v5731_v18, %v5164_v20 }
 0x1aa   : > { %v1625_v41 = vadd.f32 %v1619_v61, %v1531_v22  ;;  %v5170_v61 = vld [vmem:[%s7272_s5 + $0x50] sm:$0xf]  ;;  %v5172_v22 = vld [vmem:[%s7272_s5 + $0x58] sm:$0xf0] }
 0x1ab   : > { %3161 = vmatpush.bf16.msrb.mxu2 %v5191_v51  ;;  %v5747_v51 = vld [vmem:[%s7272_s5 + $0xc4] sm:$0xf] }
 0x1ac   : > { %v5247_v19 = vor.u32 %v5747_v51, %v5244_v40  ;;  %v5725_v51 = vld [vmem:[%s7272_s5 + $0x14] sm:$0xf] }
 0x1ae   : > { %v1713_v56 = vpop.f32.mrf.mxu2 }
 0x1af   : > { %v1719_v42 = vadd.f32 %v1713_v56, %v1625_v41  ;;  %v1807_v43 = vpop.f32.mrf.mxu3  ;;  %v1894_v4 = vpop.f32.mrf.mxu0  ;;  %3162 = vmatpush.bf16.msrb.mxu2 %v5183_v29  ;;  %v5250_v41 = vld [vmem:[%s7272_s5 + $0xd0] sm:$0xf]  ;;  %v5750_v56 = vld [vmem:[%s7272_s5 + $0xd4] sm:$0xf0]  ;;  %v5155_v29 = vor.u32 %v5730_v23, %v5154_v2  ;;  %v5741_v2 = vld [vmem:[%s7272_s5 + $0x94] sm:$0xf] }
 0x1b0   : > { %v6709_v45 = vadd.f32 %v1894_v4, %v1810_v58  ;;  %v6725_v57 = vpop.f32.mrf.mxu1  ;;  %v5749_v4 = vld [vmem:[%s7272_s5 + $0xd4] sm:$0xf]  ;;  %v5220_v23 = vld [vmem:[%s7272_s5 + $0x98] sm:$0xf0] }
 0x1b1   : > { %v1813_v44 = vadd.f32 %v1807_v43, %v1719_v42  ;;  %v5175_v42 = vor.u32 %v5733_v3, %v5172_v22  ;;  %v5251_v43 = vor.u32 %v5750_v56, %v5250_v41  ;;  %v5148_v22 = vld [vmem:[%s7272_s5 + $0x28] sm:$0xf0] }
 0x1b2   : > { %v1998_v33 = vadd.f32 %v6707_v60, %v6709_v45  ;;  %v5156_v60 = vld [vmem:[%s7272_s5 + $0x38] sm:$0xf0]  ;;  %v5234_v45 = vld [vmem:[%s7272_s5 + $0xb0] sm:$0xf] }
 0x1b3   : > { %3163 = vmatpush.bf16.msrb.mxu2 %v5175_v42  ;;  %3290 = vmatpush.bf16.msrb.mxu3 %v5251_v43  ;;  %v5235_v37 = vor.u32 %v5746_v15, %v5234_v45  ;;  %v5226_v42 = vld [vmem:[%s7272_s5 + $0xa0] sm:$0xf]  ;;  %v5744_v43 = vld [vmem:[%s7272_s5 + $0xa4] sm:$0xf0]  ;;  %v5132_v45 = vld [vmem:[%s7272_s5 + $0x8] sm:$0xf0] }
 0x1b6   : > { %v6711_v8 = vpop.f32.mrf.mxu2 }
 0x1b7   : > { %v6713_v47 = vpop.f32.mrf.mxu3  ;;  %v1896_v48 = vpop.f32.mrf.mxu0  ;;  %3164 = vmatpush.bf16.msrb.mxu2 %v5167_v7  ;;  %3291 = vmatpush.bf16.msrb.mxu3 %v5243_v31  ;;  %v2092_v35 = vadd.f32 %v6711_v8, %v1998_v33  ;;  %v5728_v8 = vld [vmem:[%s7272_s5 + $0x24] sm:$0xf0] }
 0x1b8   : > { %v6715_v50 = vadd.f32 %v1896_v48, %v1811_v36  ;;  %v6733_v46 = vpop.f32.mrf.mxu1  ;;  %v5751_v36 = vld [vmem:[%s7272_s5 + $0xe4] sm:$0xf]  ;;  %v5162_v48 = vld [vmem:[%s7272_s5 + $0x40] sm:$0xf] }
 0x1b9   : > { %v5263_v39 = vor.u32 %v5751_v36, %v5260_v24  ;;  %v5159_v36 = vor.u32 %v5729_v34, %v5156_v60  ;;  %v5745_v24 = vld [vmem:[%s7272_s5 + $0xb4] sm:$0xf]  ;;  %v5130_v34 = vld [vmem:[%s7272_s5] sm:$0xf]  ;;  %v5723_v60 = vld [vmem:[%s7272_s5 + $0x4] sm:$0xf] }
 0x1ba   : > { %v1999_v7 = vadd.f32 %v6717_v55, %v6715_v50  ;;  %v5140_v50 = vld [vmem:[%s7272_s5 + $0x18] sm:$0xf0]  ;;  %v5218_v55 = vld [vmem:[%s7272_s5 + $0x90] sm:$0xf] }
 0x1bb   : > { %3302 = vmatpush.bf16.msra.mxu0 %v5263_v39  ;;  %v5236_v39 = vld [vmem:[%s7272_s5 + $0xb8] sm:$0xf0]  ;;  %3165 = vmatpush.bf16.msrb.mxu2 %v5159_v36  ;;  %v5135_v36 = vor.u32 %v5723_v60, %v5132_v45  ;;  %v5766_v45 = vld [vmem:[%s7272_s5 + $0x154] sm:$0xf0] }
 0x1bc   : > { %v5239_v3 = vor.u32 %v5745_v24, %v5236_v39  ;;  %3292 = vmatpush.bf16.msrb.mxu3 %v5235_v37  ;;  %v5210_v37 = vld [vmem:[%s7272_s5 + $0x80] sm:$0xf]  ;;  %v5740_v24 = vld [vmem:[%s7272_s5 + $0x84] sm:$0xf0]  ;;  %v5739_v39 = vld [vmem:[%s7272_s5 + $0x84] sm:$0xf] }
 0x1be   : > { %v6719_v38 = vpop.f32.mrf.mxu2 }
 0x1bf   : > { %v1899_v49 = vpop.f32.mrf.mxu0  ;;  %v6723_v53 = vpop.f32.mrf.mxu3  ;;  %v2093_v40 = vadd.f32 %v6719_v38, %v1999_v7  ;;  %v5724_v38 = vld [vmem:[%s7272_s5 + $0x4] sm:$0xf0]  ;;  %v5428_v7 = vld [vmem:[%s7272_s5 + $0x1f8] sm:$0xf0] }
 0x1c0   : > { %v6721_v52 = vadd.f32 %v1899_v49, %v1812_v25  ;;  %v6743_v14 = vpop.f32.mrf.mxu1  ;;  %v5171_v25 = vor.u32 %v5734_v10, %v5170_v61  ;;  %v5146_v61 = vld [vmem:[%s7272_s5 + $0x20] sm:$0xf] }
 0x1c1   : > { %v5147_v41 = vor.u32 %v5728_v8, %v5146_v61  ;;  %v5346_v8 = vld [vmem:[%s7272_s5 + $0x170] sm:$0xf] }
 0x1c2   : > { %3150 = vmatpush.bf16.msrb.mxu1 %v5171_v25  ;;  %v5727_v25 = vld [vmem:[%s7272_s5 + $0x24] sm:$0xf] }
 0x1c3   : > { %v5151_v56 = vor.u32 %v5727_v25, %v5148_v22  ;;  %v5770_v25 = vld [vmem:[%s7272_s5 + $0x174] sm:$0xf0]  ;;  %v2187_v22 = vadd.f32 %v6723_v53, %v2093_v40  ;;  %v5418_v40 = vld [vmem:[%s7272_s5 + $0x1e0] sm:$0xf] }
 0x1c5   : > { %3166 = vmatpush.bf16.msrb.mxu2 %v5151_v56 }
 0x1c6   : > { %v6727_v5 = vpop.f32.mrf.mxu2 }
 0x1c7   : > { %v1901_v27 = vpop.f32.mrf.mxu0  ;;  %v6731_v54 = vpop.f32.mrf.mxu3 }
 0x1c8   : > { %v6729_v6 = vadd.f32 %v1901_v27, %v1813_v44  ;;  %v6769_v11 = vpop.f32.mrf.mxu1  ;;  %v5252_v44 = vld [vmem:[%s7272_s5 + $0xd8] sm:$0xf0]  ;;  %v5732_v27 = vld [vmem:[%s7272_s5 + $0x44] sm:$0xf0] }
 0x1c9   : > { %v5255_v49 = vor.u32 %v5749_v4, %v5252_v44  ;;  %v5163_v0 = vor.u32 %v5732_v27, %v5162_v48  ;;  %v5743_v4 = vld [vmem:[%s7272_s5 + $0xa4] sm:$0xf]  ;;  %v5227_v44 = vor.u32 %v5744_v43, %v5226_v42  ;;  %v5228_v48 = vld [vmem:[%s7272_s5 + $0xa8] sm:$0xf0]  ;;  %v5347_v42 = vor.u32 %v5770_v25, %v5346_v8  ;;  %v5769_v43 = vld [vmem:[%s7272_s5 + $0x174] sm:$0xf] }
 0x1ca   : > { %v5231_v18 = vor.u32 %v5743_v4, %v5228_v48  ;;  %v5348_v4 = vld [vmem:[%s7272_s5 + $0x178] sm:$0xf0]  ;;  %v2000_v48 = vadd.f32 %v6725_v57, %v6721_v52  ;;  %v2001_v8 = vadd.f32 %v6733_v46, %v6729_v6  ;;  %v5763_v6 = vld [vmem:[%s7272_s5 + $0x144] sm:$0xf] }
 0x1cb   : > { %3303 = vmatpush.bf16.msra.mxu0 %v5255_v49  ;;  %3151 = vmatpush.bf16.msrb.mxu1 %v5163_v0  ;;  %v2186_v49 = vadd.f32 %v6713_v47, %v2092_v35  ;;  %v5726_v47 = vld [vmem:[%s7272_s5 + $0x14] sm:$0xf0]  ;;  %v5131_v35 = vor.u32 %v5724_v38, %v5130_v34  ;;  %v5330_v34 = vld [vmem:[%s7272_s5 + $0x150] sm:$0xf] }
 0x1cc   : > { %3293 = vmatpush.bf16.msrb.mxu3 %v5227_v44  ;;  %v5139_v31 = vor.u32 %v5726_v47, %v5138_v26  ;;  %v5426_v44 = vld [vmem:[%s7272_s5 + $0x1f0] sm:$0xf]  ;;  %v2094_v57 = vadd.f32 %v6727_v5, %v2000_v48  ;;  %v5324_v48 = vld [vmem:[%s7272_s5 + $0x148] sm:$0xf0] }
 0x1ce   : > { %v6735_v12 = vpop.f32.mrf.mxu2 }
 0x1cf   : > { %v6737_v59 = vpop.f32.mrf.mxu0  ;;  %v6739_v62 = vpop.f32.mrf.mxu3  ;;  %3304 = vmatpush.bf16.msra.mxu0 %v5247_v19  ;;  %3152 = vmatpush.bf16.msrb.mxu1 %v5155_v29  ;;  %v5143_v19 = vor.u32 %v5725_v51, %v5140_v50  ;;  %v5223_v29 = vor.u32 %v5741_v2, %v5220_v23  ;;  %v5768_v50 = vld [vmem:[%s7272_s5 + $0x164] sm:$0xf0]  ;;  %v5420_v23 = vld [vmem:[%s7272_s5 + $0x1e8] sm:$0xf0] }
 0x1d0   : > { %v6843_v30 = vpop.f32.mrf.mxu1  ;;  %v2280_v21 = vadd.f32 %v6737_v59, %v2186_v49  ;;  %v5742_v59 = vld [vmem:[%s7272_s5 + $0x94] sm:$0xf0] }
 0x1d1   : > { %v5219_v33 = vor.u32 %v5742_v59, %v5218_v55  ;;  %3167 = vmatpush.bf16.msrb.mxu2 %v5143_v19  ;;  %v5786_v49 = vld [vmem:[%s7272_s5 + $0x1f4] sm:$0xf0]  ;;  %v5340_v59 = vld [vmem:[%s7272_s5 + $0x168] sm:$0xf0]  ;;  %v5784_v19 = vld [vmem:[%s7272_s5 + $0x1e4] sm:$0xf0] }
 0x1d2   : > { %v2374_v15 = vadd.f32 %v6743_v14, %v2280_v21  ;;  %v5211_v14 = vor.u32 %v5740_v24, %v5210_v37  ;;  %v5427_v52 = vor.u32 %v5786_v49, %v5426_v44  ;;  %v5419_v2 = vor.u32 %v5784_v19, %v5418_v40  ;;  %v5781_v24 = vld [vmem:[%s7272_s5 + $0x1d4] sm:$0xf]  ;;  %v5780_v49 = vld [vmem:[%s7272_s5 + $0x1c4] sm:$0xf0] }
 0x1d3   : > { %3305 = vmatpush.bf16.msra.mxu0 %v5239_v3  ;;  %3153 = vmatpush.bf16.msrb.mxu1 %v5147_v41  ;;  %v5212_v3 = vld [vmem:[%s7272_s5 + $0x88] sm:$0xf0]  ;;  %v5331_v37 = vor.u32 %v5766_v45, %v5330_v34 }
 0x1d4   : > { %3294 = vmatpush.bf16.msrb.mxu3 %v5219_v33  ;;  %v5215_v56 = vor.u32 %v5739_v39, %v5212_v3  ;;  %v5412_v3 = vld [vmem:[%s7272_s5 + $0x1d8] sm:$0xf0]  ;;  %v5308_v45 = vld [vmem:[%s7272_s5 + $0x128] sm:$0xf0] }
 0x1d5   : > { %3168 = vmatpush.bf16.msrb.mxu2 %v5135_v36  ;;  %v2188_v36 = vadd.f32 %v6731_v54, %v2094_v57 }
 0x1d6   : > { %v6745_v16 = vpop.f32.mrf.mxu2 }
 0x1d7   : > { %v6741_v13 = vpop.f32.mrf.mxu0  ;;  %v6747_v1 = vpop.f32.mrf.mxu3  ;;  %3306 = vmatpush.bf16.msra.mxu0 %v5231_v18  ;;  %3154 = vmatpush.bf16.msrb.mxu1 %v5139_v31  ;;  %v2468_v41 = vadd.f32 %v6745_v16, %v2374_v15  ;;  %v5351_v16 = vor.u32 %v5769_v43, %v5348_v4  ;;  %v5785_v18 = vld [vmem:[%s7272_s5 + $0x1f4] sm:$0xf]  ;;  %v5338_v31 = vld [vmem:[%s7272_s5 + $0x160] sm:$0xf]  ;;  %v5764_v4 = vld [vmem:[%s7272_s5 + $0x144] sm:$0xf0] }
 0x1d8   : > { %v6915_v27 = vpop.f32.mrf.mxu1  ;;  %v2281_v21 = vadd.f32 %v6741_v13, %v2187_v22  ;;  %3295 = vmatpush.bf16.msrb.mxu3 %v5211_v14  ;;  %v5431_v51 = vor.u32 %v5785_v18, %v5428_v7  ;;  %v5767_v13 = vld [vmem:[%s7272_s5 + $0x164] sm:$0xf]  ;;  %v5339_v5 = vor.u32 %v5768_v50, %v5338_v31  ;;  %v5765_v15 = vld [vmem:[%s7272_s5 + $0x154] sm:$0xf]  ;;  %v5322_v43 = vld [vmem:[%s7272_s5 + $0x140] sm:$0xf]  ;;  %v5327_v7 = vor.u32 %v5763_v6, %v5324_v48 }
 0x1d9   : > { %v2562_v55 = vadd.f32 %v6747_v1, %v2468_v41  ;;  %3440 = vmatpush.bf16.msra.mxu2 %v5351_v16  ;;  %v5343_v33 = vor.u32 %v5767_v13, %v5340_v59  ;;  %v5783_v1 = vld [vmem:[%s7272_s5 + $0x1e4] sm:$0xf]  ;;  %v5402_v16 = vld [vmem:[%s7272_s5 + $0x1c0] sm:$0xf]  ;;  %v5762_v50 = vld [vmem:[%s7272_s5 + $0x134] sm:$0xf0] }
 0x1da   : > { %v5423_v60 = vor.u32 %v5783_v1, %v5420_v23  ;;  %v5761_v13 = vld [vmem:[%s7272_s5 + $0x134] sm:$0xf]  ;;  %v5396_v1 = vld [vmem:[%s7272_s5 + $0x1b8] sm:$0xf0]  ;;  %v5306_v23 = vld [vmem:[%s7272_s5 + $0x120] sm:$0xf] }
 0x1db   : > { %3307 = vmatpush.bf16.msra.mxu0 %v5223_v29  ;;  %3155 = vmatpush.bf16.msrb.mxu1 %v5131_v35  ;;  %v2375_v29 = vadd.f32 %v6769_v11, %v2281_v21  ;;  %v5332_v35 = vld [vmem:[%s7272_s5 + $0x158] sm:$0xf0]  ;;  %v5410_v11 = vld [vmem:[%s7272_s5 + $0x1d0] sm:$0xf]  ;;  %v5403_v21 = vor.u32 %v5780_v49, %v5402_v16  ;;  %v5290_v16 = vld [vmem:[%s7272_s5 + $0x100] sm:$0xf] }
 0x1dc   : > { %3566 = vmatpush.bf16.msra.mxu3 %v5427_v52  ;;  %v5335_v14 = vor.u32 %v5765_v15, %v5332_v35  ;;  %v5404_v52 = vld [vmem:[%s7272_s5 + $0x1c8] sm:$0xf0]  ;;  %v5755_v49 = vld [vmem:[%s7272_s5 + $0x104] sm:$0xf] }
 0x1dd   : > { %3441 = vmatpush.bf16.msra.mxu2 %v5343_v33 }
 0x1de   : > { %v6780_v58 = vpop.f32.mrf.mxu2 }
 0x1df   : > { %v6749_v17 = vpop.f32.mrf.mxu0  ;;  %v6814_v63 = vpop.f32.mrf.mxu3  ;;  %3308 = vmatpush.bf16.msra.mxu0 %v5215_v56  ;;  %3427 = vmatpush.bf16.msra.mxu1 %v5347_v42  ;;  %v2469_v39 = vadd.f32 %v6780_v58, %v2375_v29  ;;  %v5415_v56 = vor.u32 %v5781_v24, %v5412_v3  ;;  %v2095_v58 = vadd.f32 %v6735_v12, %v2001_v8 }
 0x1e0   : > { %v2740_v26 = vpop.f32.mrf.mxu1  ;;  %3567 = vmatpush.bf16.msra.mxu3 %v5419_v2  ;;  %v2282_v25 = vadd.f32 %v6749_v17, %v2188_v36  ;;  %v5323_v12 = vor.u32 %v5764_v4, %v5322_v43  ;;  %v5777_v2 = vld [vmem:[%s7272_s5 + $0x1b4] sm:$0xf]  ;;  %v5774_v43 = vld [vmem:[%s7272_s5 + $0x194] sm:$0xf0] }
 0x1e1   : > { %v2563_v46 = vadd.f32 %v6814_v63, %v2469_v39  ;;  %3442 = vmatpush.bf16.msra.mxu2 %v5335_v14  ;;  %v5388_v14 = vld [vmem:[%s7272_s5 + $0x1a8] sm:$0xf0]  ;;  %v5773_v4 = vld [vmem:[%s7272_s5 + $0x194] sm:$0xf] }
 0x1e2   : > { %v2376_v18 = vadd.f32 %v6843_v30, %v2282_v25  ;;  %v5314_v30 = vld [vmem:[%s7272_s5 + $0x130] sm:$0xf]  ;;  %v5758_v25 = vld [vmem:[%s7272_s5 + $0x114] sm:$0xf0] }
 0x1e3   : > { %3579 = vmatpush.bf16.msrb.mxu0 %v5431_v51  ;;  %3428 = vmatpush.bf16.msra.mxu1 %v5339_v5  ;;  %v2189_v51 = vadd.f32 %v6739_v62, %v2095_v58  ;;  %v5316_v62 = vld [vmem:[%s7272_s5 + $0x138] sm:$0xf0]  ;;  %v5778_v5 = vld [vmem:[%s7272_s5 + $0x1b4] sm:$0xf0] }
 0x1e4   : > { %v5319_v19 = vor.u32 %v5761_v13, %v5316_v62 }
 0x1e5   : > { %3443 = vmatpush.bf16.msra.mxu2 %v5327_v7  ;;  %v5292_v7 = vld [vmem:[%s7272_s5 + $0x108] sm:$0xf0] }
 0x1e6   : > { %v6854_v28 = vpop.f32.mrf.mxu2  ;;  %v5295_v13 = vor.u32 %v5755_v49, %v5292_v7 }
 0x1e7   : > { %v6803_v9 = vpop.f32.mrf.mxu0  ;;  %v6891_v10 = vpop.f32.mrf.mxu3  ;;  %3580 = vmatpush.bf16.msrb.mxu0 %v5423_v60  ;;  %3429 = vmatpush.bf16.msra.mxu1 %v5331_v37  ;;  %v2470_v31 = vadd.f32 %v6854_v28, %v2376_v18  ;;  %v5394_v28 = vld [vmem:[%s7272_s5 + $0x1b0] sm:$0xf]  ;;  %v5759_v60 = vld [vmem:[%s7272_s5 + $0x124] sm:$0xf]  ;;  %v5386_v37 = vld [vmem:[%s7272_s5 + $0x1a0] sm:$0xf] }
 0x1e8   : > { %v2742_v17 = vpop.f32.mrf.mxu1  ;;  %v2283_v59 = vadd.f32 %v6803_v9, %v2189_v51  ;;  %v5395_v33 = vor.u32 %v5778_v5, %v5394_v28  ;;  %v5760_v9 = vld [vmem:[%s7272_s5 + $0x124] sm:$0xf0]  ;;  %v5372_v51 = vld [vmem:[%s7272_s5 + $0x188] sm:$0xf0] }
 0x1e9   : > { %v2564_v15 = vadd.f32 %v6891_v10, %v2470_v31  ;;  %v5307_v36 = vor.u32 %v5760_v9, %v5306_v23  ;;  %3444 = vmatpush.bf16.msra.mxu2 %v5319_v19  ;;  %v5311_v10 = vor.u32 %v5759_v60, %v5308_v45 }
 0x1ea   : > { %v2377_v3 = vadd.f32 %v6915_v27, %v2283_v59  ;;  %v5378_v27 = vld [vmem:[%s7272_s5 + $0x190] sm:$0xf] }
 0x1eb   : > { %3581 = vmatpush.bf16.msrb.mxu0 %v5415_v56  ;;  %3430 = vmatpush.bf16.msra.mxu1 %v5323_v12  ;;  %v5300_v56 = vld [vmem:[%s7272_s5 + $0x118] sm:$0xf0]  ;;  %v5379_v48 = vor.u32 %v5774_v43, %v5378_v27 }
 0x1ed   : > { %3445 = vmatpush.bf16.msra.mxu2 %v5311_v10 }
 0x1ee   : > { %v6917_v20 = vpop.f32.mrf.mxu2 }
 0x1ef   : > { %v6859_v32 = vpop.f32.mrf.mxu0  ;;  %v6971_v61 = vpop.f32.mrf.mxu3  ;;  %v2471_v6 = vadd.f32 %v6917_v20, %v2377_v3  ;;  %v5756_v20 = vld [vmem:[%s7272_s5 + $0x104] sm:$0xf0] }
 0x1f0   : > { %v2656_v38 = vadd.f32 %v6859_v32, %v2562_v55  ;;  %v5782_v32 = vld [vmem:[%s7272_s5 + $0x1d4] sm:$0xf0] }
 0x1f1   : > { %v5411_v54 = vor.u32 %v5782_v32, %v5410_v11  ;;  %v5776_v11 = vld [vmem:[%s7272_s5 + $0x1a4] sm:$0xf0]  ;;  %v5775_v32 = vld [vmem:[%s7272_s5 + $0x1a4] sm:$0xf]  ;;  %v2565_v31 = vadd.f32 %v6971_v61, %v2471_v6 }
 0x1f2   : > { %v2750_v42 = vadd.f32 %v2740_v26, %v2656_v38  ;;  %v5779_v26 = vld [vmem:[%s7272_s5 + $0x1c4] sm:$0xf]  ;;  %v5399_v38 = vor.u32 %v5777_v2, %v5396_v1  ;;  %v5387_v39 = vor.u32 %v5776_v11, %v5386_v37  ;;  %v5391_v8 = vor.u32 %v5775_v32, %v5388_v14 }
 0x1f3   : > { %3568 = vmatpush.bf16.msra.mxu3 %v5411_v54  ;;  %v5298_v54 = vld [vmem:[%s7272_s5 + $0x110] sm:$0xf] }
 0x1f6   : > { %v2834_v47 = vpop.f32.mrf.mxu2 }
 0x1f7   : > { %v6919_v0 = vpop.f32.mrf.mxu0  ;;  %v2928_v22 = vpop.f32.mrf.mxu3  ;;  %v2844_v44 = vadd.f32 %v2834_v47, %v2750_v42  ;;  %v5407_v47 = vor.u32 %v5779_v26, %v5404_v52  ;;  %3569 = vmatpush.bf16.msra.mxu3 %v5403_v21  ;;  %v5370_v21 = vld [vmem:[%s7272_s5 + $0x180] sm:$0xf]  ;;  %v5772_v26 = vld [vmem:[%s7272_s5 + $0x184] sm:$0xf0] }
 0x1f8   : > { %v2657_v57 = vadd.f32 %v6919_v0, %v2563_v46  ;;  %v5315_v0 = vor.u32 %v5762_v50, %v5314_v30  ;;  %v2745_v42 = vpop.f32.mrf.mxu1  ;;  %v5291_v30 = vor.u32 %v5756_v20, %v5290_v16 }
 0x1f9   : > { %v2938_v55 = vadd.f32 %v2928_v22, %v2844_v44  ;;  %3582 = vmatpush.bf16.msrb.mxu0 %v5407_v47  ;;  %v5757_v22 = vld [vmem:[%s7272_s5 + $0x114] sm:$0xf]  ;;  %v5771_v47 = vld [vmem:[%s7272_s5 + $0x184] sm:$0xf] }
 0x1fa   : > { %v2751_v34 = vadd.f32 %v2742_v17, %v2657_v57  ;;  %3431 = vmatpush.bf16.msra.mxu1 %v5315_v0  ;;  %v5299_v17 = vor.u32 %v5758_v25, %v5298_v54  ;;  %v5303_v12 = vor.u32 %v5757_v22, %v5300_v56  ;;  %v5375_v62 = vor.u32 %v5771_v47, %v5372_v51  ;;  %v5793_v47 = vld [vmem:[%s7274_s7 + $0x30] sm:$0xff] }
 0x1fb   : > { %3570 = vmatpush.bf16.msra.mxu3 %v5395_v33  ;;  %v5801_v51 = vld [vmem:[%s7274_s7 + $0x70] sm:$0xff] }
 0x1fc   : > { %3446 = vmatpush.bf16.msra.mxu2 %v5303_v12 }
 0x1fd   : > { %3583 = vmatpush.bf16.msrb.mxu0 %v5399_v38 }
 0x1fe   : > { %v2836_v63 = vpop.f32.mrf.mxu2  ;;  %3432 = vmatpush.bf16.msra.mxu1 %v5307_v36 }
 0x1ff   : > { %v6995_v53 = vpop.f32.mrf.mxu0  ;;  %v2930_v35 = vpop.f32.mrf.mxu3  ;;  %v2845_v24 = vadd.f32 %v2836_v63, %v2751_v34  ;;  %3571 = vmatpush.bf16.msra.mxu3 %v5387_v39 }
 0x200   : > { %v2658_v58 = vadd.f32 %v6995_v53, %v2564_v15  ;;  %v5380_v53 = vld [vmem:[%s7272_s5 + $0x198] sm:$0xf0]  ;;  %v2747_v33 = vpop.f32.mrf.mxu1  ;;  %3447 = vmatpush.bf16.msra.mxu2 %v5295_v13  ;;  %v5799_v13 = vld [vmem:[%s7274_s7 + $0x60] sm:$0xff] }
 0x201   : > { %v2939_v44 = vadd.f32 %v2930_v35, %v2845_v24  ;;  %3584 = vmatpush.bf16.msrb.mxu0 %v5391_v8  ;;  %v5383_v63 = vor.u32 %v5773_v4, %v5380_v53  ;;  %v3040_v35 = vld [vmem:[%s7271_s4] sm:$0x1] }
 0x202   : > { %v2752_v52 = vadd.f32 %v2745_v42, %v2658_v58  ;;  %3433 = vmatpush.bf16.msra.mxu1 %v5299_v17 }
 0x203   : > { %3572 = vmatpush.bf16.msra.mxu3 %v5379_v48 }
 0x205   : > { %3585 = vmatpush.bf16.msrb.mxu0 %v5383_v63 }
 0x206   : > { %v2839_v46 = vpop.f32.mrf.mxu2  ;;  %3434 = vmatpush.bf16.msra.mxu1 %v5291_v30  ;;  %v5800_v30 = vld [vmem:[%s7274_s7 + $0x68] sm:$0xff] }
 0x207   : > { %v7064_v41 = vpop.f32.mrf.mxu0  ;;  %v2846_v50 = vadd.f32 %v2839_v46, %v2752_v52  ;;  %v2933_v0 = vpop.f32.mrf.mxu3  ;;  %v5794_v52 = vld [vmem:[%s7274_s7 + $0x38] sm:$0xff] }
 0x208   : > { %v2659_v28 = vadd.f32 %v7064_v41, %v2565_v31  ;;  %v5792_v31 = vld [vmem:[%s7274_s7 + $0x28] sm:$0xff] }
 0x209   : > { %v2940_v61 = vadd.f32 %v2933_v0, %v2846_v50  ;;  %3586 = vmatpush.bf16.msrb.mxu0 %v5375_v62  ;;  %v5791_v50 = vld [vmem:[%s7274_s7 + $0x20] sm:$0xff]  ;;  %v5798_v0 = vld [vmem:[%s7274_s7 + $0x58] sm:$0xff]  ;;  %v5789_v62 = vld [vmem:[%s7274_s7 + $0x10] sm:$0xff] }
 0x20a   : > { %v2753_v23 = vadd.f32 %v2747_v33, %v2659_v28  ;;  %v5797_v28 = vld [vmem:[%s7274_s7 + $0x50] sm:$0xff]  ;;  %v5787_v33 = vld [vmem:[%s7274_s7] sm:$0xff] }
 0x20e   : > { %v2841_v2 = vpop.f32.mrf.mxu2 }
 0x20f   : > { %v3022_v40 = vpop.f32.mrf.mxu0  ;;  %v2847_v45 = vadd.f32 %v2841_v2, %v2753_v23  ;;  %v2935_v24 = vpop.f32.mrf.mxu3 }
 0x210   : > { %v3032_v29 = vadd.f32 %v3022_v40, %v2938_v55  ;;  %v5371_v55 = vor.u32 %v5772_v26, %v5370_v21 }
 0x211   : > { %v2941_v10 = vadd.f32 %v2935_v24, %v2847_v45 }
 0x212   : > { %3036 = vst [vmem:[#allocation3] sm:$0xff] %v3032_v29  ;;  %3573 = vmatpush.bf16.msra.mxu3 %v5371_v55  ;;  %v5790_v55 = vld [vmem:[%s7274_s7 + $0x18] sm:$0xff] }
 0x217   : > { %v3024_v18 = vpop.f32.mrf.mxu0 }
 0x218   : > { %v3033_v57 = vadd.f32 %v3024_v18, %v2939_v44 }
 0x219   : > { %v3042_v5 = vld [vmem:[#allocation3] sm:$0x1]  ;;  %v3043_v59 = vld [vmem:[#allocation3 + $0x1] sm:$0x1]  ;;  %v3181_v40 = vld [vmem:[#allocation3 + $0x2] sm:$0x1] }
 0x21a   : > { %3037 = vst [vmem:[#allocation3 + $0x8] sm:$0xff] %v3033_v57  ;;  %v3182_v19 = vld [vmem:[#allocation3 + $0x3] sm:$0x1]  ;;  %v3044_v29 = vmax.f32 %v3042_v5, %v3043_v59  ;;  %v5802_v57 = vld [vmem:[%s7274_s7 + $0x78] sm:$0xff] }
 0x21b   : > { %v3183_v38 = vmax.f32 %v3181_v40, %v3182_v19  ;;  %v5788_v5 = vld [vmem:[%s7274_s7 + $0x8] sm:$0xff] }
 0x21c   : > { %v5796_v59 = vld [vmem:[%s7274_s7 + $0x48] sm:$0xff] }
 0x21f   : > { %v3027_v1 = vpop.f32.mrf.mxu0 }
 0x220   : > { %v3034_v34 = vadd.f32 %v3027_v1, %v2940_v61  ;;  %v5795_v61 = vld [vmem:[%s7274_s7 + $0x40] sm:$0xff] }
 0x221   : > { %v3045_v9 = vld [vmem:[#allocation3 + $0x8] sm:$0x1]  ;;  %v3184_v60 = vld [vmem:[#allocation3 + $0xa] sm:$0x1]  ;;  %v3047_v36 = vld [vmem:[#allocation3 + $0x9] sm:$0x1] }
 0x222   : > { %3038 = vst [vmem:[#allocation3 + $0x10] sm:$0xff] %v3034_v34  ;;  %v3046_v41 = vmax.f32 %v3044_v29, %v3045_v9  ;;  %v3185_v15 = vmax.f32 %v3183_v38, %v3184_v60  ;;  %v3186_v37 = vld [vmem:[#allocation3 + $0xb] sm:$0x1] }
 0x224   : > { %v3048_v11 = vmax.f32 %v3046_v41, %v3047_v36  ;;  %v3187_v32 = vmax.f32 %v3185_v15, %v3186_v37  ;;  %v3041_v41 = vld [vmem:[%s7273_s6] sm:$0x3] }
 0x226   : > { %v3049_v39 = vadd.f32 %v3048_v11, %v3040_v35  ;;  %v3188_v14 = vadd.f32 %v3187_v32, %v3040_v35 }
 0x227   : > { %v3029_v54 = vpop.f32.mrf.mxu0 }
 0x228   : > { %v3035_v3 = vadd.f32 %v3029_v54, %v2941_v10  ;;  %v3050_v8 = vmax.f32 %v3049_v39, 0.0  ;;  %v3189_v25 = vmax.f32 %v3188_v14, 0.0 }
 0x229   : > { %v3320_v42 = vld [vmem:[#allocation3 + $0x10] sm:$0x1]  ;;  %v3321_v58 = vld [vmem:[#allocation3 + $0x11] sm:$0x1]  ;;  %v3459_v27 = vld [vmem:[#allocation3 + $0x12] sm:$0x1] }
 0x22a   : > { %3039 = vst [vmem:[#allocation3 + $0x18] sm:$0xff] %v3035_v3  ;;  %v3051_v22 = vpack.c.bf16 %v3050_v8, %v3050_v8  ;;  %v3190_v56 = vpack.c.bf16 %v3189_v25, %v3189_v25  ;;  %v3460_v43 = vld [vmem:[#allocation3 + $0x13] sm:$0x1]  ;;  %v3322_v4 = vmax.f32 %v3320_v42, %v3321_v58 }
 0x22b   : > { %v3461_v6 = vmax.f32 %v3459_v27, %v3460_v43 }
 0x22c   : > { %3156 = vmatmul.bf16.vlgmr.msrb.gmra.mxu1 %v3051_v22  ;;  %3169 = vmatmul.bf16.vlgmr.msrb.gmra.mxu2 %v3051_v22 }
 0x22d   : > { %3296 = vmatmul.bf16.vlgmr.msrb.gmra.mxu3 %v3190_v56  ;;  %3309 = vmatmul.bf16.vlgmr.msra.gmra.mxu0 %v3190_v56 }
 0x22e   : > { %3735 = vmatpush.bf16.msrb.mxu1 %v5794_v52  ;;  %3748 = vmatpush.bf16.msrb.mxu2 %v5802_v57 }
 0x231   : > { %v3323_v46 = vld [vmem:[#allocation3 + $0x18] sm:$0x1]  ;;  %v3462_v17 = vld [vmem:[#allocation3 + $0x1a] sm:$0x1]  ;;  %v3325_v12 = vld [vmem:[#allocation3 + $0x19] sm:$0x1] }
 0x232   : > { %v3324_v53 = vmax.f32 %v3322_v4, %v3323_v46  ;;  %v3463_v44 = vmax.f32 %v3461_v6, %v3462_v17  ;;  %v3464_v48 = vld [vmem:[#allocation3 + $0x1b] sm:$0x1]  ;;  %3736 = vmatpush.bf16.msrb.mxu1 %v5793_v47  ;;  %3749 = vmatpush.bf16.msrb.mxu2 %v5801_v51  ;;  %v3638_v17 = vld [vmem:[%s7275_s8] sm:$0x1] }
 0x234   : > { %v3326_v16 = vmax.f32 %v3324_v53, %v3325_v12  ;;  %v3465_v20 = vmax.f32 %v3463_v44, %v3464_v48 }
 0x236   : > { %v3327_v49 = vadd.f32 %v3326_v16, %v3040_v35  ;;  %v3466_v18 = vadd.f32 %v3465_v20, %v3040_v35  ;;  %3737 = vmatpush.bf16.msrb.mxu1 %v5792_v31  ;;  %3750 = vmatpush.bf16.msrb.mxu2 %v5800_v30 }
 0x238   : > { %v3328_v63 = vmax.f32 %v3327_v49, 0.0  ;;  %v3467_v7 = vmax.f32 %v3466_v18, 0.0 }
 0x23a   : > { %v3329_v21 = vpack.c.bf16 %v3328_v63, %v3328_v63  ;;  %v3468_v26 = vpack.c.bf16 %v3467_v7, %v3467_v7  ;;  %3738 = vmatpush.bf16.msrb.mxu1 %v5791_v50  ;;  %3751 = vmatpush.bf16.msrb.mxu2 %v5799_v13 }
 0x23c   : > { %3435 = vmatmul.bf16.vlgmr.msra.gmra.mxu1 %v3329_v21  ;;  %3448 = vmatmul.bf16.vlgmr.msra.gmra.mxu2 %v3329_v21 }
 0x23d   : > { %3574 = vmatmul.bf16.vlgmr.msra.gmra.mxu3 %v3468_v26  ;;  %3587 = vmatmul.bf16.vlgmr.msrb.gmra.mxu0 %v3468_v26 }
 0x23e   : > { %3739 = vmatpush.bf16.msrb.mxu1 %v5790_v55  ;;  %3752 = vmatpush.bf16.msrb.mxu2 %v5798_v0 }
 0x242   : > { %3740 = vmatpush.bf16.msrb.mxu1 %v5789_v62  ;;  %3753 = vmatpush.bf16.msrb.mxu2 %v5797_v28 }
 0x246   : > { %3741 = vmatpush.bf16.msrb.mxu1 %v5788_v5  ;;  %3754 = vmatpush.bf16.msrb.mxu2 %v5796_v59 }
 0x24a   : > { %3742 = vmatpush.bf16.msrb.mxu1 %v5787_v33  ;;  %3755 = vmatpush.bf16.msrb.mxu2 %v5795_v61 }
 0x2a9   : > { %v3157_v40 = vpop.f32.mrf.mxu1 }
 0x2aa   : > { %v3310_v19 = vpop.f32.mrf.mxu0 }
 0x2ab   : > { %v3316_v36 = vrot.slane %v3310_v19, 7 }
 0x2af   : > { %v3170_v2 = vpop.f32.mrf.mxu2 }
 0x2b0   : > { %v3297_v1 = vpop.f32.mrf.mxu3  ;;  %v3176_v29 = vrot.slane %v3170_v2, 7 }
 0x2b1   : > { %v3159_v23 = vpop.f32.mrf.mxu1  ;;  %v3317_v11 = vsel %vm3177_vm0, %v3297_v1, %v3316_v36 }
 0x2b2   : > { %v3312_v34 = vpop.f32.mrf.mxu0  ;;  %v3178_v45 = vsel %vm3177_vm0, %v3157_v40, %v3176_v29 }
 0x2b3   : > { %v3180_v35 = vadd.f32 %v3178_v45, %v3041_v41 }
 0x2b5   : > { %v3319_v10 = vadd.f32 %v3317_v11, %v3180_v35 }
 0x2b7   : > { %v3172_v38 = vpop.f32.mrf.mxu2 }
 0x2b8   : > { %v3299_v9 = vpop.f32.mrf.mxu3 }
 0x2b9   : > { %v3436_v60 = vpop.f32.mrf.mxu1 }
 0x2ba   : > { %v3588_v15 = vpop.f32.mrf.mxu0 }
 0x2bb   : > { %v3594_v14 = vrot.slane %v3588_v15, 7 }
 0x2bf   : > { %v3449_v37 = vpop.f32.mrf.mxu2 }
 0x2c0   : > { %v3455_v32 = vrot.slane %v3449_v37, 7  ;;  %v3575_v24 = vpop.f32.mrf.mxu3 }
 0x2c1   : > { %v3438_v39 = vpop.f32.mrf.mxu1  ;;  %v3595_v25 = vsel %vm3177_vm0, %v3575_v24, %v3594_v14 }
 0x2c2   : > { %v3456_v54 = vsel %vm3177_vm0, %v3436_v60, %v3455_v32  ;;  %v3590_v3 = vpop.f32.mrf.mxu0 }
 0x2c3   : > { %v3458_v8 = vadd.f32 %v3456_v54, %v3319_v10 }
 0x2c5   : > { %v3597_v22 = vadd.f32 %v3595_v25, %v3458_v8 }
 0x2c7   : > { %v3598_v56 = vmax.f32 %v3597_v22, 0.0  ;;  %v3451_v42 = vpop.f32.mrf.mxu2 }
 0x2c8   : > { %v3577_v58 = vpop.f32.mrf.mxu3 }
 0x2c9   : > { %v3600_v27 = vperm.slane %v3598_v56, 0  ;;  %v3601_v43 = vperm.slane %v3598_v56, 1 }
 0x2cb   : > { %v3604_v4 = vpack.c.bf16 %v3600_v27, %v3600_v27  ;;  %v3605_v6 = vpack.c.bf16 %v3601_v43, %v3601_v43 }
 0x2cd   : > { %3743 = vmatmul.bf16.vlgmr.msrb.gmra.mxu1 %v3604_v4  ;;  %3756 = vmatmul.bf16.vlgmr.msrb.gmra.mxu2 %v3605_v6 }
 0x34a   : > { %v3744_v46 = vpop.f32.mrf.mxu1 }
 0x34b   : > { %v3745_v53 = vadd.f32 %v3744_v46, %v3638_v17 }
 0x350   : > { %v3757_v44 = vpop.f32.mrf.mxu2 }
 0x351   : > { %v3758_v12 = vadd.f32 %v3757_v44, %v3745_v53 }
 0x352   : > { %v3746_v48 = vpop.f32.mrf.mxu1 }
 0x353   : > { %v3761_v16 = vperm.slane %v3758_v12, 0 }
 0x355   : > { %3762 = vst [vmem:[%s330_s27] sm:$0xff] %v3761_v16 }
 0x358   : > { %v3759_v20 = vpop.f32.mrf.mxu2 }
 0x359 PF: > { %s19_s30 = sadd.s32 1, %s5819_s30  }
 0x35a   : > { %p16_p4 = scmp.ge.s32.totalorder %s19_s30, 4  }
 0x35c   :  { %18 = sbr.rel (!%p16_p4) target bundleno = 1 (0x1), region = 116 }

</bundles_post_ra>
